<compile_context>
chip_gen: v5e
topology: v5e:2x2
jax: 0.10.0
libtpu: 0.0.40
codegen_flags: <defaults>
</compile_context>

<pallas_src>
import functools

import jax
import jax.numpy as jnp
from jax.experimental import pallas as pl
from jax.experimental.pallas import tpu as pltpu

_LANES = 128
_SUBLANE_BF16 = 16  # bf16 packs 16 sublanes per vreg -> align tap offsets to 16


def _ceil_to(v: int, m: int) -> int:
    return ((v + m - 1) // m) * m


def _batch_tile(n: int) -> int:
    """Largest divisor of n that is <= 8 (images fused per grid step)."""
    for bt in range(min(n, 8), 0, -1):
        if n % bt == 0:
            return bt
    return 1


# ----------------------------------------------------------------------------
# Pallas kernel: fused direct 3x3 conv (3 dw-folded tap matmuls, K = 3*Cin)
#                + bias + optional ReLU, f32 accumulation, bf16/f32 output
# ----------------------------------------------------------------------------
def _conv3x3_kernel(x_ref, w_ref, b_ref, o_ref, *, Wp: int, relu: bool):
    """x_ref: (Bt, Lc, 3*Cin) bf16 -- dw-folded, width-padded flattened images
       w_ref: (3, 3*Cin, TCO) bf16 -- tap(dh)-major weights
       b_ref: (1, TCO) f32
       o_ref: (Bt, M, TCO)         -- M = H * Wp padded-width output rows."""
    Bt, M, _ = o_ref.shape
    bias = b_ref[...]                                        # (1, TCO)
    for bimg in range(Bt):                                   # static unroll
        # Tap dh = 0, 1, 2: contiguous, sublane-aligned row windows (offset dh*Wp).
        acc = jnp.dot(x_ref[bimg, 0:M, :], w_ref[0],
                      preferred_element_type=jnp.float32)
        for dh in (1, 2):
            off = dh * Wp
            acc = acc + jnp.dot(x_ref[bimg, off:off + M, :], w_ref[dh],
                                preferred_element_type=jnp.float32)
        acc = acc + bias
        if relu:
            acc = jnp.maximum(acc, 0.0)
        o_ref[bimg] = acc.astype(o_ref.dtype)


def pack_conv(w_oihw, b):
    """One-time weight packing: OIHW -> (dh, dw*Cin + c, Cout_padded) bf16."""
    Cout, Cin = int(w_oihw.shape[0]), int(w_oihw.shape[1])
    Cout_p = _ceil_to(Cout, _LANES)
    # (Cout, Cin, kh, kw) -> (kh, kw, Cin, Cout) -> (3, 3*Cin, Cout); the merged
    # K index is dw*Cin + c, matching the dw-folded activation channel order.
    wm = jnp.transpose(w_oihw, (2, 3, 1, 0)).reshape(3, 3 * Cin, Cout)
    wm = jnp.pad(wm, ((0, 0), (0, 0), (0, Cout_p - Cout))).astype(jnp.bfloat16)
    bm = jnp.pad(b, (0, Cout_p - Cout)).astype(jnp.float32).reshape(1, Cout_p)
    return {"w": wm, "b": bm, "cout": Cout, "cin": Cin}


def conv3x3(x_nhwc, packed, *, relu: bool, out_dtype=jnp.float32):
    """3x3, stride 1, padding 1 conv as a fused Pallas TPU kernel (NHWC)."""
    N, H, W, Cin = x_nhwc.shape
    wm, bm = packed["w"], packed["b"]
    Cout = packed["cout"]
    K3, Cout_p = wm.shape[1], wm.shape[2]
    assert K3 == 3 * Cin, (K3, Cin)
    TCO = _LANES
    n_co = Cout_p // TCO

    Wp = _ceil_to(W + 2, _SUBLANE_BF16)  # aligned tap offsets dh*Wp
    Hp = H + 3                           # (1,2) row padding keeps windows in-bounds
    Lc = (H + 2) * Wp                    # dw-folded rows needed by the 3 taps
    M = H * Wp                           # padded-width output rows per image

    # bf16 BEFORE pad (halves the pad/copy and the kernel input DMA).
    xb = x_nhwc.astype(jnp.bfloat16)
    xp = jnp.pad(xb, ((0, 0), (1, 2), (1, Wp - W - 1), (0, 0)))   # (N, Hp, Wp, Cin)
    xf = xp.reshape(N, Hp * Wp, Cin)
    # dw folding: row r carries [x(r), x(r+1), x(r+2)] along channels -> K = 3*Cin.
    xc = jnp.concatenate([xf[:, 0:Lc], xf[:, 1:Lc + 1], xf[:, 2:Lc + 2]], axis=-1)

    Bt = _batch_tile(N)
    Nb = N // Bt

    out_itemsize = jnp.dtype(out_dtype).itemsize
    flops = 2 * N * H * W * Cin * Cout * 9           # valid (un-padded) math only
    bytes_accessed = (xc.size * 2 + wm.size * 2 + bm.size * 4
                      + N * M * Cout_p * out_itemsize)

    out = pl.pallas_call(
        functools.partial(_conv3x3_kernel, Wp=Wp, relu=relu),
        out_shape=jax.ShapeDtypeStruct((N, M, Cout_p), out_dtype),
        grid=(n_co, Nb),                             # batch innermost -> weights resident
        in_specs=[
            pl.BlockSpec((Bt, Lc, K3), lambda co, nb: (nb, 0, 0)),
            pl.BlockSpec((3, K3, TCO), lambda co, nb: (0, 0, co)),
            pl.BlockSpec((1, TCO), lambda co, nb: (0, co)),
        ],
        out_specs=pl.BlockSpec((Bt, M, TCO), lambda co, nb: (nb, 0, co)),
        compiler_params=pltpu.CompilerParams(
            dimension_semantics=("parallel", "parallel")),
        cost_estimate=pl.CostEstimate(flops=flops, transcendentals=0,
                                      bytes_accessed=bytes_accessed),
    )(xc, wm, bm)

    # Drop the padded width columns and the Cout lane padding (cheap XLA views).
    out = out.reshape(N, H, Wp, Cout_p)[:, :, :W, :Cout]
    return out


# ----------------------------------------------------------------------------
# XLA glue: first conv (K=9, not MXU-worthy), pooling, batchnorm
# ----------------------------------------------------------------------------
def conv3x3_xla(x_nhwc, w_hwio, b, relu: bool):
    y = jax.lax.conv_general_dilated(
        x_nhwc, w_hwio, window_strides=(1, 1), padding=((1, 1), (1, 1)),
        dimension_numbers=("NHWC", "HWIO", "NHWC"))
    y = y + b
    if relu:
        y = jnp.maximum(y, 0.0)
    return y


def maxpool(x_nhwc, k: int, s: int):
    # nn.MaxPool2d(k, s): VALID windows, floor((H - k)/s) + 1
    init = jnp.array(-jnp.inf, dtype=x_nhwc.dtype)
    return jax.lax.reduce_window(
        x_nhwc, init, jax.lax.max,
        window_dimensions=(1, k, k, 1),
        window_strides=(1, s, s, 1),
        padding="VALID")


def batchnorm(x_nhwc, gamma, beta, eps=1e-5):
    # nn.BatchNorm2d in (default) training mode: batch statistics over (N, H, W)
    mean = jnp.mean(x_nhwc, axis=(0, 1, 2), keepdims=True)
    var = jnp.mean((x_nhwc - mean) ** 2, axis=(0, 1, 2), keepdims=True)
    return (x_nhwc - mean) * jax.lax.rsqrt(var + eps) * gamma + beta


# ----------------------------------------------------------------------------
# Encoder forward (mirrors the nn.Sequential exactly)
# ----------------------------------------------------------------------------
def encoder_forward(packed, x_nchw):
    x = jnp.transpose(x_nchw, (0, 2, 3, 1))                            # NCHW -> NHWC

    x = conv3x3_xla(x, packed["c1"]["w_hwio"], packed["c1"]["b"],      # Conv2d(1,64)+ReLU
                    relu=True)
    x = maxpool(x, 2, 2)                                               # MaxPool2d(2,2)

    x = conv3x3(x, packed["c2"], relu=True, out_dtype=jnp.bfloat16)    # Conv2d(64,128)+ReLU
    x = maxpool(x, 2, 2)                                               # MaxPool2d(2,2)

    x = conv3x3(x, packed["c3"], relu=True, out_dtype=jnp.float32)     # Conv2d(128,256)+ReLU
    x = batchnorm(x, packed["g3"], packed["t3"])                       # BatchNorm2d(256)

    x = conv3x3(x, packed["c4"], relu=True, out_dtype=jnp.bfloat16)    # Conv2d(256,256)+ReLU
    x = maxpool(x, 1, 2)                                               # MaxPool2d(1,2)

    x = conv3x3(x, packed["c5"], relu=True, out_dtype=jnp.float32)     # Conv2d(256,h)+ReLU
    x = batchnorm(x, packed["g5"], packed["t5"])                       # BatchNorm2d(h)
    x = maxpool(x, 2, 1)                                               # MaxPool2d(2,1)

    x = conv3x3(x, packed["c6"], relu=False, out_dtype=jnp.float32)    # Conv2d(h,h)
    x = batchnorm(x, packed["g6"], packed["t6"])                       # BatchNorm2d(h)

    return jnp.transpose(x, (0, 3, 1, 2))                              # NHWC -> NCHW


# ----------------------------------------------------------------------------
# Parameters: deterministic synthetic init (PyTorch shapes) + one-time packing
# ----------------------------------------------------------------------------
def init_params(key, hidden_size: int):
    params = {}

    def conv_init(k, cin, cout):
        k1, k2 = jax.random.split(k)
        fan_in = cin * 9
        w = jax.random.normal(k1, (cout, cin, 3, 3), jnp.float32) / jnp.sqrt(fan_in)
        b = 0.01 * jax.random.normal(k2, (cout,), jnp.float32)
        return w, b

    def bn_init(k, c):
        k1, k2 = jax.random.split(k)
        g = 1.0 + 0.1 * jax.random.normal(k1, (c,), jnp.float32)
        t = 0.1 * jax.random.normal(k2, (c,), jnp.float32)
        return g, t

    keys = jax.random.split(key, 9)
    params["w1"], params["b1"] = conv_init(keys[0], 1, 64)
    params["w2"], params["b2"] = conv_init(keys[1], 64, 128)
    params["w3"], params["b3"] = conv_init(keys[2], 128, 256)
    params["g3"], params["t3"] = bn_init(keys[3], 256)
    params["w4"], params["b4"] = conv_init(keys[4], 256, 256)
    params["w5"], params["b5"] = conv_init(keys[5], 256, hidden_size)
    params["g5"], params["t5"] = bn_init(keys[6], hidden_size)
    params["w6"], params["b6"] = conv_init(keys[7], hidden_size, hidden_size)
    params["g6"], params["t6"] = bn_init(keys[8], hidden_size)
    return params


def pack_params(p):
    """One-time packing (transpose / lane-pad / bf16 cast) -- NOT per forward."""
    return {
        "c1": {"w_hwio": jnp.transpose(p["w1"], (2, 3, 1, 0)), "b": p["b1"]},
        "c2": pack_conv(p["w2"], p["b2"]),
        "c3": pack_conv(p["w3"], p["b3"]),
        "c4": pack_conv(p["w4"], p["b4"]),
        "c5": pack_conv(p["w5"], p["b5"]),
        "c6": pack_conv(p["w6"], p["b6"]),
        "g3": p["g3"], "t3": p["t3"],
        "g5": p["g5"], "t5": p["t5"],
        "g6": p["g6"], "t6": p["t6"],
    }


def _conv_selftest():
    """Pallas dw-folded conv vs XLA conv on bf16-rounded inputs (loose tol)."""
    key = jax.random.PRNGKey(1)
    kx, kw, kb = jax.random.split(key, 3)
    x = jax.random.normal(kx, (2, 8, 8, 64), jnp.float32)
    w = jax.random.normal(kw, (128, 64, 3, 3), jnp.float32) / 24.0
    b = 0.01 * jax.random.normal(kb, (128,), jnp.float32)
    got = conv3x3(x, pack_conv(w, b), relu=True, out_dtype=jnp.float32)
    xr = x.astype(jnp.bfloat16).astype(jnp.float32)
    wr = jnp.transpose(w.astype(jnp.bfloat16).astype(jnp.float32), (2, 3, 1, 0))
    ref = conv3x3_xla(xr, wr, b, relu=True)
    err = float(jnp.max(jnp.abs(got - ref)))
    assert err < 0.1, f"conv3x3 self-test failed, max abs err {err}"


if __name__ == "__main__":
    hidden_size = 32
    key = jax.random.PRNGKey(0)
    k_par, k_x = jax.random.split(key)

    raw_params = init_params(k_par, hidden_size)
    packed = pack_params(raw_params)

    # Small input consistent with Conv2d(1, ...): batch=2, channels=1, 16x16
    x = jax.random.normal(k_x, (2, 1, 16, 16), jnp.float32)

    _conv_selftest()

    fwd = jax.jit(functools.partial(encoder_forward, packed))
    out = fwd(x)
    jax.block_until_ready(out)

    # Expected: (2, hidden_size, 1, 1) after the pooling cascade on 16x16 input
    assert out.shape == (2, hidden_size, 1, 1), out.shape
    assert bool(jnp.all(jnp.isfinite(out)))
    print("KERNEL_OK")
</pallas_src>

<mosaic_0001>
module attributes {stable_mosaic.version = 11 : i64} {
  func.func @_conv3x3_kernel(%arg0: i32, %arg1: i32, %arg2: memref<2x160x192xbf16, #tpu.memory_space<vmem>>, %arg3: memref<3x192x128xbf16, #tpu.memory_space<vmem>>, %arg4: memref<1x128xf32, #tpu.memory_space<vmem>>, %arg5: memref<2x128x128xf32, #tpu.memory_space<vmem>>) attributes {dimension_semantics = [#tpu.dimension_semantics<parallel>, #tpu.dimension_semantics<parallel>], iteration_bounds = array<i64: 1, 1>, scalar_prefetch = 0 : i64, scratch_operands = 0 : i64, tpu.core_type = #tpu.core_type<tc>, window_params = [{transform_indices = @transform_0, window_bounds = array<i64: 2, 160, 192>}, {transform_indices = @transform_1, window_bounds = array<i64: 3, 192, 128>}, {transform_indices = @transform_2, window_bounds = array<i64: 1, 128>}, {transform_indices = @transform_3, window_bounds = array<i64: 2, 128, 128>}]} {
    %c0 = arith.constant 0 : index
    %c0_0 = arith.constant 0 : index
    %0 = vector.load %arg4[%c0, %c0_0] : memref<1x128xf32, #tpu.memory_space<vmem>>, vector<1x128xf32>
    %c0_1 = arith.constant 0 : index
    %c0_2 = arith.constant 0 : index
    %c0_3 = arith.constant 0 : index
    %1 = vector.load %arg2[%c0_1, %c0_2, %c0_3] : memref<2x160x192xbf16, #tpu.memory_space<vmem>>, vector<1x128x192xbf16>
    %2 = vector.shape_cast %1 : vector<1x128x192xbf16> to vector<128x192xbf16>
    %c0_4 = arith.constant 0 : index
    %c0_5 = arith.constant 0 : index
    %c0_6 = arith.constant 0 : index
    %3 = vector.load %arg3[%c0_4, %c0_5, %c0_6] : memref<3x192x128xbf16, #tpu.memory_space<vmem>>, vector<1x192x128xbf16>
    %4 = vector.shape_cast %3 : vector<1x192x128xbf16> to vector<192x128xbf16>
    %cst = arith.constant dense<0.000000e+00> : vector<128x128xf32>
    %5 = tpu.matmul %2, %4, %cst {dimension_numbers = #tpu.dot_dimension_numbers<[1], [0], [0], [1], [0, 0, 1, 1], [], []>} : vector<128x192xbf16>, vector<192x128xbf16>, vector<128x128xf32> -> vector<128x128xf32>
    %c0_7 = arith.constant 0 : index
    %c16 = arith.constant 16 : index
    %c0_8 = arith.constant 0 : index
    %6 = vector.load %arg2[%c0_7, %c16, %c0_8] : memref<2x160x192xbf16, #tpu.memory_space<vmem>>, vector<1x128x192xbf16>
    %7 = vector.shape_cast %6 : vector<1x128x192xbf16> to vector<128x192xbf16>
    %c1 = arith.constant 1 : index
    %c0_9 = arith.constant 0 : index
    %c0_10 = arith.constant 0 : index
    %8 = vector.load %arg3[%c1, %c0_9, %c0_10] : memref<3x192x128xbf16, #tpu.memory_space<vmem>>, vector<1x192x128xbf16>
    %9 = vector.shape_cast %8 : vector<1x192x128xbf16> to vector<192x128xbf16>
    %cst_11 = arith.constant dense<0.000000e+00> : vector<128x128xf32>
    %10 = tpu.matmul %7, %9, %cst_11 {dimension_numbers = #tpu.dot_dimension_numbers<[1], [0], [0], [1], [0, 0, 1, 1], [], []>} : vector<128x192xbf16>, vector<192x128xbf16>, vector<128x128xf32> -> vector<128x128xf32>
    %11 = arith.addf %5, %10 : vector<128x128xf32>
    %c0_12 = arith.constant 0 : index
    %c32 = arith.constant 32 : index
    %c0_13 = arith.constant 0 : index
    %12 = vector.load %arg2[%c0_12, %c32, %c0_13] : memref<2x160x192xbf16, #tpu.memory_space<vmem>>, vector<1x128x192xbf16>
    %13 = vector.shape_cast %12 : vector<1x128x192xbf16> to vector<128x192xbf16>
    %c2 = arith.constant 2 : index
    %c0_14 = arith.constant 0 : index
    %c0_15 = arith.constant 0 : index
    %14 = vector.load %arg3[%c2, %c0_14, %c0_15] : memref<3x192x128xbf16, #tpu.memory_space<vmem>>, vector<1x192x128xbf16>
    %15 = vector.shape_cast %14 : vector<1x192x128xbf16> to vector<192x128xbf16>
    %cst_16 = arith.constant dense<0.000000e+00> : vector<128x128xf32>
    %16 = tpu.matmul %13, %15, %cst_16 {dimension_numbers = #tpu.dot_dimension_numbers<[1], [0], [0], [1], [0, 0, 1, 1], [], []>} : vector<128x192xbf16>, vector<192x128xbf16>, vector<128x128xf32> -> vector<128x128xf32>
    %17 = arith.addf %11, %16 : vector<128x128xf32>
    %18 = vector.broadcast %0 : vector<1x128xf32> to vector<128x128xf32>
    %19 = arith.addf %17, %18 : vector<128x128xf32>
    %cst_17 = arith.constant 0.000000e+00 : f32
    %20 = vector.broadcast %cst_17 : f32 to vector<128x128xf32>
    %21 = arith.maximumf %19, %20 : vector<128x128xf32>
    %c0_18 = arith.constant 0 : index
    %c0_19 = arith.constant 0 : index
    %c0_20 = arith.constant 0 : index
    %22 = vector.load %arg5[%c0_18, %c0_19, %c0_20] : memref<2x128x128xf32, #tpu.memory_space<vmem>>, vector<1x128x128xf32>
    %23 = vector.shape_cast %22 : vector<1x128x128xf32> to vector<128x128xf32>
    %24 = vector.shape_cast %21 : vector<128x128xf32> to vector<1x128x128xf32>
    tpu.vector_store %arg5[%c0_18, %c0_19, %c0_20], %24 {strides = array<i32>} : memref<2x128x128xf32, #tpu.memory_space<vmem>>, vector<1x128x128xf32>,
    %c1_21 = arith.constant 1 : index
    %c0_22 = arith.constant 0 : index
    %c0_23 = arith.constant 0 : index
    %25 = vector.load %arg2[%c1_21, %c0_22, %c0_23] : memref<2x160x192xbf16, #tpu.memory_space<vmem>>, vector<1x128x192xbf16>
    %26 = vector.shape_cast %25 : vector<1x128x192xbf16> to vector<128x192xbf16>
    %c0_24 = arith.constant 0 : index
    %c0_25 = arith.constant 0 : index
    %c0_26 = arith.constant 0 : index
    %27 = vector.load %arg3[%c0_24, %c0_25, %c0_26] : memref<3x192x128xbf16, #tpu.memory_space<vmem>>, vector<1x192x128xbf16>
    %28 = vector.shape_cast %27 : vector<1x192x128xbf16> to vector<192x128xbf16>
    %cst_27 = arith.constant dense<0.000000e+00> : vector<128x128xf32>
    %29 = tpu.matmul %26, %28, %cst_27 {dimension_numbers = #tpu.dot_dimension_numbers<[1], [0], [0], [1], [0, 0, 1, 1], [], []>} : vector<128x192xbf16>, vector<192x128xbf16>, vector<128x128xf32> -> vector<128x128xf32>
    %c1_28 = arith.constant 1 : index
    %c16_29 = arith.constant 16 : index
    %c0_30 = arith.constant 0 : index
    %30 = vector.load %arg2[%c1_28, %c16_29, %c0_30] : memref<2x160x192xbf16, #tpu.memory_space<vmem>>, vector<1x128x192xbf16>
    %31 = vector.shape_cast %30 : vector<1x128x192xbf16> to vector<128x192xbf16>
    %c1_31 = arith.constant 1 : index
    %c0_32 = arith.constant 0 : index
    %c0_33 = arith.constant 0 : index
    %32 = vector.load %arg3[%c1_31, %c0_32, %c0_33] : memref<3x192x128xbf16, #tpu.memory_space<vmem>>, vector<1x192x128xbf16>
    %33 = vector.shape_cast %32 : vector<1x192x128xbf16> to vector<192x128xbf16>
    %cst_34 = arith.constant dense<0.000000e+00> : vector<128x128xf32>
    %34 = tpu.matmul %31, %33, %cst_34 {dimension_numbers = #tpu.dot_dimension_numbers<[1], [0], [0], [1], [0, 0, 1, 1], [], []>} : vector<128x192xbf16>, vector<192x128xbf16>, vector<128x128xf32> -> vector<128x128xf32>
    %35 = arith.addf %29, %34 : vector<128x128xf32>
    %c1_35 = arith.constant 1 : index
    %c32_36 = arith.constant 32 : index
    %c0_37 = arith.constant 0 : index
    %36 = vector.load %arg2[%c1_35, %c32_36, %c0_37] : memref<2x160x192xbf16, #tpu.memory_space<vmem>>, vector<1x128x192xbf16>
    %37 = vector.shape_cast %36 : vector<1x128x192xbf16> to vector<128x192xbf16>
    %c2_38 = arith.constant 2 : index
    %c0_39 = arith.constant 0 : index
    %c0_40 = arith.constant 0 : index
    %38 = vector.load %arg3[%c2_38, %c0_39, %c0_40] : memref<3x192x128xbf16, #tpu.memory_space<vmem>>, vector<1x192x128xbf16>
    %39 = vector.shape_cast %38 : vector<1x192x128xbf16> to vector<192x128xbf16>
    %cst_41 = arith.constant dense<0.000000e+00> : vector<128x128xf32>
    %40 = tpu.matmul %37, %39, %cst_41 {dimension_numbers = #tpu.dot_dimension_numbers<[1], [0], [0], [1], [0, 0, 1, 1], [], []>} : vector<128x192xbf16>, vector<192x128xbf16>, vector<128x128xf32> -> vector<128x128xf32>
    %41 = arith.addf %35, %40 : vector<128x128xf32>
    %42 = vector.broadcast %0 : vector<1x128xf32> to vector<128x128xf32>
    %43 = arith.addf %41, %42 : vector<128x128xf32>
    %cst_42 = arith.constant 0.000000e+00 : f32
    %44 = vector.broadcast %cst_42 : f32 to vector<128x128xf32>
    %45 = arith.maximumf %43, %44 : vector<128x128xf32>
    %c1_43 = arith.constant 1 : index
    %c0_44 = arith.constant 0 : index
    %c0_45 = arith.constant 0 : index
    %46 = vector.load %arg5[%c1_43, %c0_44, %c0_45] : memref<2x128x128xf32, #tpu.memory_space<vmem>>, vector<1x128x128xf32>
    %47 = vector.shape_cast %46 : vector<1x128x128xf32> to vector<128x128xf32>
    %48 = vector.shape_cast %45 : vector<128x128xf32> to vector<1x128x128xf32>
    tpu.vector_store %arg5[%c1_43, %c0_44, %c0_45], %48 {strides = array<i32>} : memref<2x128x128xf32, #tpu.memory_space<vmem>>, vector<1x128x128xf32>,
    return
  }
  func.func @transform_0(%arg0: i32, %arg1: i32) -> (i32, i32, i32) {
    %c0_i32 = arith.constant 0 : i32
    %c0_i32_0 = arith.constant 0 : i32
    %c0_i32_1 = arith.constant 0 : i32
    return %arg1, %c0_i32, %c0_i32_0 : i32, i32, i32
  }
  func.func @transform_1(%arg0: i32, %arg1: i32) -> (i32, i32, i32) {
    %c0_i32 = arith.constant 0 : i32
    %c0_i32_0 = arith.constant 0 : i32
    %c0_i32_1 = arith.constant 0 : i32
    return %c0_i32, %c0_i32_0, %arg0 : i32, i32, i32
  }
  func.func @transform_2(%arg0: i32, %arg1: i32) -> (i32, i32) {
    %c0_i32 = arith.constant 0 : i32
    %c0_i32_0 = arith.constant 0 : i32
    return %c0_i32, %arg0 : i32, i32
  }
  func.func @transform_3(%arg0: i32, %arg1: i32) -> (i32, i32, i32) {
    %c0_i32 = arith.constant 0 : i32
    %c0_i32_0 = arith.constant 0 : i32
    return %arg1, %c0_i32, %arg0 : i32, i32, i32
  }
}

</mosaic_0001>

<bundles_post_ra>
// kernel: tpu_custom_call.1
= control target key start
LH: loop header
LB: loop body
LE: loop exit
PB: predicated region body
PF: predicated region fallthrough
CT: control target
= control target key end

     0   :  { %8 = vsyncpa [#allocation3], 0  ;;  %s2958_s0 = inlined_call_operand.hbm [shape: bf16[2,160,192], index: 0, kind: input, shape index: {}]   ;;  %s2959_s1 = inlined_call_operand.hbm [shape: bf16[3,192,128], index: 1, kind: input, shape index: {}]   ;;  %s2960_s2 = inlined_call_operand.vmem [shape: f32[1,128], index: 2, kind: input, shape index: {}]   ;;  %s2961_s3 = inlined_call_operand.hbm [shape: f32[2,128,128], index: 3, kind: output, shape index: {}]  }
   0x1   :  { %9 = vsyncpa [#allocation6], 0 }
   0x2   :  { %10 = vsyncpa [#allocation4], 0  ;;  %s15_s14 = sshll.u32 %s2958_s0, 4  ;;  %s2679_s15 = smov [#allocation2]   ;;  %s16_s14 = int_to_ptr.hbm [resolvable:$true] %s15_s14 }
   0x3   :  { %s17_s16 = sshll.u32 %s2679_s15, 4  ;;  %s28_s19 = sshll.u32 %s2959_s1, 4  ;;  %s18_s16 = int_to_ptr.vmem [resolvable:$true] %s17_s16  ;;  %s29_s19 = int_to_ptr.hbm [resolvable:$true] %s28_s19 }
   0x4   :  { %s2680_s20 = smov 128   ;;  %s2681_s21 = smov 8  }
   0x5   :  { %23 = dma.hbm_to_vmem [thread:$0]  %s16_s14, 5120, %s18_s16, [#allocation3], %s2680_s20, %s2680_s20, %s2681_s21  }
   0x6   :  { %s2682_s22 = smov [#allocation5]   ;;  %s2683_s24 = smov 64  }
   0x7   :  { %s30_s23 = sshll.u32 %s2682_s22, 4  ;;  %s2684_s0 = smov 4   ;;  %s31_s23 = int_to_ptr.vmem [resolvable:$true] %s30_s23 }
   0x8   :  { %36 = dma.hbm_to_vmem [thread:$0]  %s29_s19, 4608, %s31_s23, [#allocation6], %s2683_s24, %s2683_s24, %s2684_s0  }
   0x9   :  { %2673 = dma.done.wait [#allocation3], 5120  }
   0xa   :  { %2674 = vsyncadd [#allocation3], 4294962176 }
   0xb   :  { %2675 = dma.done.wait [#allocation6], 4608  }
   0xc   :  { %2676 = vsyncadd [#allocation6], 4294962688  ;;  %v2490_v0 = vld [vmem:[#allocation5 + $0x98] sm:$0xff]  ;;  %v2489_v4 = vld [vmem:[#allocation5 + $0x90] sm:$0xff]  ;;  %vm260_vm0 = vcmask 523264   ;;  %s1831_s29 = sshll.u32 %s2961_s3, 4  ;;  %s1832_s29 = int_to_ptr.hbm [resolvable:$true] %s1831_s29 }
   0xd   :  { %v2494_v1 = vld [vmem:[#allocation5 + $0xb8] sm:$0xff]  ;;  %285 = vmatpush.bf16.msra.mxu0 %v2490_v0  ;;  %v2493_v5 = vld [vmem:[#allocation5 + $0xb0] sm:$0xff]  ;;  %v2488_v8 = vld [vmem:[#allocation5 + $0x88] sm:$0xff] }
   0xe   :  { %v2476_v2 = vld [vmem:[#allocation5 + $0x38] sm:$0xff]  ;;  %338 = vmatpush.bf16.msra.mxu1 %v2494_v1  ;;  %v2475_v6 = vld [vmem:[#allocation5 + $0x30] sm:$0xff]  ;;  %v2492_v9 = vld [vmem:[#allocation5 + $0xa8] sm:$0xff] }
   0xf   :  { %v2480_v3 = vld [vmem:[#allocation5 + $0x58] sm:$0xff]  ;;  %467 = vmatpush.bf16.msra.mxu2 %v2476_v2  ;;  %v2479_v7 = vld [vmem:[#allocation5 + $0x50] sm:$0xff]  ;;  %v2474_v10 = vld [vmem:[#allocation5 + $0x28] sm:$0xff] }
  0x10   :  { %520 = vmatpush.bf16.msra.mxu3 %v2480_v3  ;;  %v2478_v11 = vld [vmem:[#allocation5 + $0x48] sm:$0xff]  ;;  %v2487_v12 = vld [vmem:[#allocation5 + $0x80] sm:$0xff]  ;;  %v2455_v15 = vld [vmem:[#allocation2 + $0x14] sm:$0xf] }
  0x11   :  { %286 = vmatpush.bf16.msra.mxu0 %v2489_v4  ;;  %v2491_v13 = vld [vmem:[#allocation5 + $0xa0] sm:$0xff]  ;;  %v1849_v16 = vld [vmem:[#allocation2 + $0x18] sm:$0xf0]  ;;  %v1969_v19 = vld [vmem:[#allocation2 + $0x8] sm:$0xf0] }
  0x12   :  { %339 = vmatpush.bf16.msra.mxu1 %v2493_v5  ;;  %v2473_v14 = vld [vmem:[#allocation5 + $0x20] sm:$0xff]  ;;  %v2522_v20 = vld [vmem:[#allocation5 + $0x118] sm:$0xff]  ;;  %v1852_v22 = vor.u32 %v2455_v15, %v1849_v16  ;;  %v2485_v26 = vld [vmem:[#allocation5 + $0x70] sm:$0xff] }
  0x13   :  { %468 = vmatpush.bf16.msra.mxu2 %v2475_v6  ;;  %v2477_v17 = vld [vmem:[#allocation5 + $0x40] sm:$0xff]  ;;  %v2518_v21 = vld [vmem:[#allocation5 + $0xf8] sm:$0xff]  ;;  %v2517_v27 = vld [vmem:[#allocation5 + $0xf0] sm:$0xff] }
  0x14   :  { %521 = vmatpush.bf16.msra.mxu3 %v2479_v7  ;;  %v2453_v18 = vld [vmem:[#allocation2 + $0x4] sm:$0xf]  ;;  %v2486_v24 = vld [vmem:[#allocation5 + $0x78] sm:$0xff]  ;;  %v2471_v28 = vld [vmem:[#allocation5 + $0x10] sm:$0xff] }
  0x15   :  { %287 = vmatpush.bf16.msra.mxu0 %v2488_v8  ;;  %v1972_v23 = vor.u32 %v2453_v18, %v1969_v19  ;;  %v2472_v25 = vld [vmem:[#allocation5 + $0x18] sm:$0xff]  ;;  %v2484_v29 = vld [vmem:[#allocation5 + $0x68] sm:$0xff]  ;;  %v2483_v31 = vld [vmem:[#allocation5 + $0x60] sm:$0xff] }
  0x16   :  { %340 = vmatpush.bf16.msra.mxu1 %v2492_v9  ;;  %v2470_v30 = vld [vmem:[#allocation5 + $0x8] sm:$0xff]  ;;  %v2469_v32 = vld [vmem:[#allocation5] sm:$0xff]  ;;  %v1847_v33 = vld [vmem:[#allocation2 + $0x10] sm:$0xf] }
  0x17   :  { %469 = vmatpush.bf16.msra.mxu2 %v2474_v10  ;;  %v2456_v34 = vld [vmem:[#allocation2 + $0x14] sm:$0xf0]  ;;  %v2457_v35 = vld [vmem:[#allocation2 + $0x24] sm:$0xf]  ;;  %v1857_v36 = vld [vmem:[#allocation2 + $0x28] sm:$0xf0] }
  0x18   :  { %522 = vmatpush.bf16.msra.mxu3 %v2478_v11  ;;  %v1967_v37 = vld [vmem:[#allocation2] sm:$0xf]  ;;  %v2454_v38 = vld [vmem:[#allocation2 + $0x4] sm:$0xf0]  ;;  %v2560_v39 = vld [vmem:[#allocation5 + $0x98] sm:$0xff]  ;;  %v1848_v41 = vor.u32 %v2456_v34, %v1847_v33  ;;  %v1860_v42 = vor.u32 %v2457_v35, %v1857_v36 }
  0x19   :  { %288 = vmatpush.bf16.msra.mxu0 %v2487_v12  ;;  %v2564_v40 = vld [vmem:[#allocation5 + $0xb8] sm:$0xff]  ;;  %v1968_v43 = vor.u32 %v2454_v38, %v1967_v37  ;;  %v2559_v44 = vld [vmem:[#allocation5 + $0x90] sm:$0xff]  ;;  %v2516_v47 = vld [vmem:[#allocation5 + $0xe8] sm:$0xff] }
  0x1a   :  { %341 = vmatpush.bf16.msra.mxu1 %v2491_v13  ;;  %v2521_v45 = vld [vmem:[#allocation5 + $0x110] sm:$0xff]  ;;  %v2558_v48 = vld [vmem:[#allocation5 + $0x88] sm:$0xff]  ;;  %v1855_v49 = vld [vmem:[#allocation2 + $0x20] sm:$0xf] }
  0x1b   :  { %470 = vmatpush.bf16.msra.mxu2 %v2473_v14  ;;  %v2563_v46 = vld [vmem:[#allocation5 + $0xb0] sm:$0xff]  ;;  %v2458_v50 = vld [vmem:[#allocation2 + $0x24] sm:$0xf0]  ;;  %v1865_v52 = vld [vmem:[#allocation2 + $0x38] sm:$0xf0] }
  0x1c   :  { %523 = vmatpush.bf16.msra.mxu3 %v2477_v17  ;;  %v2459_v51 = vld [vmem:[#allocation2 + $0x34] sm:$0xf]  ;;  %v1856_v53 = vor.u32 %v2458_v50, %v1855_v49  ;;  %v2515_v55 = vld [vmem:[#allocation5 + $0xe0] sm:$0xff]  ;;  %v1863_v57 = vld [vmem:[#allocation2 + $0x30] sm:$0xf] }
  0x1d   :  { %1957 = vmatmul.msk.bf16.vlgmr.msra.gmra.mxu1 %vm260_vm0, %v1852_v22  ;;  %289 = vmatpush.bf16.msra.mxu0 %v2486_v24  ;;  %v1868_v54 = vor.u32 %v2459_v51, %v1865_v52  ;;  %v2557_v56 = vld [vmem:[#allocation5 + $0x80] sm:$0xff]  ;;  %v2460_v58 = vld [vmem:[#allocation2 + $0x34] sm:$0xf0]  ;;  %v1873_v60 = vld [vmem:[#allocation2 + $0x48] sm:$0xf0] }
  0x1e   :  { %774 = vmatpush.bf16.msrb.mxu1 %v2518_v21  ;;  %v2461_v59 = vld [vmem:[#allocation2 + $0x44] sm:$0xf]  ;;  %v1864_v61 = vor.u32 %v2460_v58, %v1863_v57  ;;  %v2520_v63 = vld [vmem:[#allocation5 + $0x108] sm:$0xff]  ;;  %v2514_v1 = vld [vmem:[#allocation5 + $0xd8] sm:$0xff] }
  0x1f   :  { %2021 = vmatmul.msk.bf16.vlgmr.msra.gmra.mxu3 %vm260_vm0, %v1972_v23  ;;  %471 = vmatpush.bf16.msra.mxu2 %v2472_v25  ;;  %v1876_v62 = vor.u32 %v2461_v59, %v1873_v60  ;;  %v2562_v0 = vld [vmem:[#allocation5 + $0xa8] sm:$0xff]  ;;  %v2556_v2 = vld [vmem:[#allocation5 + $0x78] sm:$0xff]  ;;  %v1871_v3 = vld [vmem:[#allocation2 + $0x40] sm:$0xf] }
  0x20   :  { %827 = vmatpush.bf16.msrb.mxu3 %v2522_v20  ;;  %v2462_v4 = vld [vmem:[#allocation2 + $0x44] sm:$0xf0]  ;;  %v2463_v5 = vld [vmem:[#allocation2 + $0x54] sm:$0xf]  ;;  %v1881_v6 = vld [vmem:[#allocation2 + $0x58] sm:$0xf0] }
  0x21   :  { %290 = vmatpush.bf16.msra.mxu0 %v2485_v26  ;;  %v1872_v7 = vor.u32 %v2462_v4, %v1871_v3  ;;  %v1884_v8 = vor.u32 %v2463_v5, %v1881_v6  ;;  %v2513_v9 = vld [vmem:[#allocation5 + $0xd0] sm:$0xff]  ;;  %v2464_v12 = vld [vmem:[#allocation2 + $0x54] sm:$0xf0]  ;;  %v2465_v13 = vld [vmem:[#allocation2 + $0x64] sm:$0xf] }
  0x22   :  { %775 = vmatpush.bf16.msrb.mxu1 %v2517_v27  ;;  %v2555_v10 = vld [vmem:[#allocation5 + $0x70] sm:$0xff]  ;;  %v1889_v14 = vld [vmem:[#allocation2 + $0x68] sm:$0xf0]  ;;  %v2519_v17 = vld [vmem:[#allocation5 + $0x100] sm:$0xff] }
  0x23   :  { %472 = vmatpush.bf16.msra.mxu2 %v2471_v28  ;;  %v1879_v11 = vld [vmem:[#allocation2 + $0x50] sm:$0xf]  ;;  %v1892_v16 = vor.u32 %v2465_v13, %v1889_v14  ;;  %v2561_v18 = vld [vmem:[#allocation5 + $0xa0] sm:$0xff]  ;;  %v2512_v19 = vld [vmem:[#allocation5 + $0xc8] sm:$0xff] }
  0x24   :  { %828 = vmatpush.bf16.msrb.mxu3 %v2521_v45  ;;  %v1880_v15 = vor.u32 %v2464_v12, %v1879_v11  ;;  %v2554_v20 = vld [vmem:[#allocation5 + $0x68] sm:$0xff]  ;;  %v1887_v21 = vld [vmem:[#allocation2 + $0x60] sm:$0xf]  ;;  %v2467_v23 = vld [vmem:[#allocation2 + $0x74] sm:$0xf] }
  0x25   :  { %291 = vmatpush.bf16.msra.mxu0 %v2484_v29  ;;  %v1897_v24 = vld [vmem:[#allocation2 + $0x78] sm:$0xf0]  ;;  %v2511_v27 = vld [vmem:[#allocation5 + $0xc0] sm:$0xff]  ;;  %v1895_v29 = vld [vmem:[#allocation2 + $0x70] sm:$0xf] }
  0x26   :  { %776 = vmatpush.bf16.msrb.mxu1 %v2516_v47  ;;  %v1900_v26 = vor.u32 %v2467_v23, %v1897_v24  ;;  %v2553_v28 = vld [vmem:[#allocation5 + $0x60] sm:$0xff]  ;;  %v2550_v35 = vld [vmem:[#allocation5 + $0x58] sm:$0xff]  ;;  %v2545_v51 = vld [vmem:[#allocation5 + $0x30] sm:$0xff] }
  0x27   :  { %473 = vmatpush.bf16.msra.mxu2 %v2470_v30  ;;  %v2468_v30 = vld [vmem:[#allocation2 + $0x74] sm:$0xf0]  ;;  %v2587_v52 = vld [vmem:[#allocation5 + $0xf0] sm:$0xff]  ;;  %v2041_v58 = vld [vmem:[#allocation2 + $0x38] sm:$0xf0] }
  0x28   :  { %829 = vmatpush.bf16.msrb.mxu3 %v2520_v63  ;;  %v1896_v33 = vor.u32 %v2468_v30, %v1895_v29  ;;  %v2592_v36 = vld [vmem:[#allocation5 + $0x118] sm:$0xff]  ;;  %v2525_v59 = vld [vmem:[#allocation2 + $0xb4] sm:$0xf]  ;;  %v2544_v14 = vld [vmem:[#allocation5 + $0x28] sm:$0xff] }
  0x29   :  { %292 = vmatpush.bf16.msra.mxu0 %v2483_v31  ;;  %v2481_v31 = vld [vmem:[#allocation2 + $0x84] sm:$0xf]  ;;  %v2546_v37 = vld [vmem:[#allocation5 + $0x38] sm:$0xff]  ;;  %v2549_v5 = vld [vmem:[#allocation5 + $0x50] sm:$0xff] }
  0x2a   :  { %777 = vmatpush.bf16.msrb.mxu1 %v2515_v55  ;;  %v2588_v38 = vld [vmem:[#allocation5 + $0xf8] sm:$0xff]  ;;  %v2497_v55 = vld [vmem:[#allocation2 + $0x34] sm:$0xf]  ;;  %v2161_v23 = vld [vmem:[#allocation2 + $0xc8] sm:$0xf0] }
  0x2b   :  { %474 = vmatpush.bf16.msra.mxu2 %v2469_v32  ;;  %v1905_v32 = vld [vmem:[#allocation2 + $0x88] sm:$0xf0]  ;;  %v2526_v57 = vld [vmem:[#allocation2 + $0xb4] sm:$0xf0]  ;;  %v2153_v60 = vld [vmem:[#allocation2 + $0xb8] sm:$0xf0] }
  0x2c   :  { %293 = vmatmul.bf16.vlgmr.msra.gmra.mxu0 %v1848_v41  ;;  %830 = vmatpush.bf16.msrb.mxu3 %v2519_v17  ;;  %v1908_v34 = vor.u32 %v2481_v31, %v1905_v32  ;;  %v2734_v3 = vor.u32 %v2525_v59, %v2153_v60  ;;  %v2591_v6 = vld [vmem:[#allocation5 + $0x110] sm:$0xff]  ;;  %v2500_v17 = vld [vmem:[#allocation2 + $0x44] sm:$0xf0] }
  0x2d   :  { %1174 = vmatpush.bf16.msrb.mxu0 %v2560_v39  ;;  %1958 = vmatmul.msk.bf16.gmra.mxu1 %vm260_vm0, %v1860_v42  ;;  %v1903_v39 = vld [vmem:[#allocation2 + $0x80] sm:$0xf] }
  0x2e   :  { %475 = vmatmul.bf16.vlgmr.msra.gmra.mxu2 %v1968_v43  ;;  %778 = vmatpush.bf16.msrb.mxu1 %v2514_v1  ;;  %v2495_v43 = vld [vmem:[#allocation2 + $0x24] sm:$0xf] }
  0x2f   :  { %1227 = vmatpush.bf16.msrb.mxu2 %v2564_v40  ;;  %2022 = vmatmul.msk.bf16.gmra.mxu3 %vm260_vm0, %v1852_v22  ;;  %v2466_v22 = vld [vmem:[#allocation2 + $0x64] sm:$0xf0] }
  0x30   :  { %v1888_v25 = vor.u32 %v2466_v22, %v1887_v21  ;;  %1409 = vmatpush.bf16.msra.mxu3 %v2550_v35  ;;  %v2482_v40 = vld [vmem:[#allocation2 + $0x84] sm:$0xf0]  ;;  %v2049_v21 = vld [vmem:[#allocation2 + $0x48] sm:$0xf0]  ;;  %v2527_v22 = vld [vmem:[#allocation2 + $0xc4] sm:$0xf] }
  0x31   :  { %1175 = vmatpush.bf16.msrb.mxu0 %v2559_v44  ;;  %v2033_v44 = vld [vmem:[#allocation2 + $0x28] sm:$0xf0]  ;;  %v1904_v45 = vor.u32 %v2482_v40, %v1903_v39  ;;  %v2744_v32 = vor.u32 %v2527_v22, %v2161_v23 }
  0x32   :  { %779 = vmatpush.bf16.msrb.mxu1 %v2513_v9 }
  0x33   :  { %1228 = vmatpush.bf16.msrb.mxu2 %v2563_v46 }
  0x34   :  { %1410 = vmatpush.bf16.msra.mxu3 %v2549_v5 }
  0x35   :  { %1176 = vmatpush.bf16.msrb.mxu0 %v2558_v48  ;;  %v2036_v48 = vor.u32 %v2495_v43, %v2033_v44  ;;  %v2585_v43 = vld [vmem:[#allocation5 + $0xe0] sm:$0xff]  ;;  %v2055_v44 = vld [vmem:[#allocation2 + $0x50] sm:$0xf] }
  0x36   :  { %780 = vmatpush.bf16.msrb.mxu1 %v2512_v19  ;;  %v2159_v19 = vld [vmem:[#allocation2 + $0xc0] sm:$0xf] }
  0x37   :  { %1229 = vmatpush.bf16.msrb.mxu2 %v2562_v0 }
  0x39   :  { %1177 = vmatpush.bf16.msrb.mxu0 %v2557_v56  ;;  %v2151_v56 = vld [vmem:[#allocation2 + $0xb0] sm:$0xf] }
  0x3a   :  { %781 = vmatpush.bf16.msrb.mxu1 %v2511_v27  ;;  %v2732_v63 = vor.u32 %v2526_v57, %v2151_v56 }
  0x3b   :  { %1230 = vmatpush.bf16.msrb.mxu2 %v2561_v18  ;;  %v2499_v18 = vld [vmem:[#allocation2 + $0x44] sm:$0xf] }
  0x3c   :  { %298 = vmatmul.bf16.gmra.mxu0 %v1856_v53  ;;  %v2052_v31 = vor.u32 %v2499_v18, %v2049_v21  ;;  %v2065_v18 = vld [vmem:[#allocation2 + $0x68] sm:$0xf0] }
  0x3d   :  { %1959 = vmatmul.msk.bf16.gmra.mxu1 %vm260_vm0, %v1868_v54  ;;  %1178 = vmatpush.bf16.msrb.mxu0 %v2556_v2  ;;  %v2044_v2 = vor.u32 %v2497_v55, %v2041_v58 }
  0x3e   :  { %480 = vmatmul.bf16.gmra.mxu2 %v1848_v41  ;;  %v2031_v41 = vld [vmem:[#allocation2 + $0x20] sm:$0xf]  ;;  %1356 = vmatpush.bf16.msra.mxu1 %v2546_v37 }
  0x3f   :  { %2023 = vmatmul.msk.bf16.gmra.mxu3 %vm260_vm0, %v1860_v42  ;;  %1715 = vmatpush.bf16.msra.mxu2 %v2592_v36  ;;  %v2496_v42 = vld [vmem:[#allocation2 + $0x24] sm:$0xf0] }
  0x40   :  { %v2032_v46 = vor.u32 %v2496_v42, %v2031_v41  ;;  %v2543_v42 = vld [vmem:[#allocation5 + $0x20] sm:$0xff] }
  0x41   :  { %1179 = vmatpush.bf16.msrb.mxu0 %v2555_v10 }
  0x42   :  { %1357 = vmatpush.bf16.msra.mxu1 %v2545_v51  ;;  %v2169_v51 = vld [vmem:[#allocation2 + $0xd8] sm:$0xf0] }
  0x43   :  { %1716 = vmatpush.bf16.msra.mxu2 %v2591_v6 }
  0x45   :  { %1180 = vmatpush.bf16.msrb.mxu0 %v2554_v20  ;;  %v2528_v20 = vld [vmem:[#allocation2 + $0xc4] sm:$0xf0] }
  0x46   :  { %1358 = vmatpush.bf16.msra.mxu1 %v2544_v14  ;;  %v2742_v27 = vor.u32 %v2528_v20, %v2159_v19  ;;  %v2504_v14 = vld [vmem:[#allocation2 + $0x64] sm:$0xf0]  ;;  %v2531_v19 = vld [vmem:[#allocation2 + $0xe4] sm:$0xf]  ;;  %v2177_v20 = vld [vmem:[#allocation2 + $0xe8] sm:$0xf0] }
  0x49   :  { %1181 = vmatpush.bf16.msrb.mxu0 %v2553_v28 }
  0x4a   :  { %1359 = vmatpush.bf16.msra.mxu1 %v2543_v42 }
  0x4c   :  { %303 = vmatmul.bf16.gmra.mxu0 %v1864_v61 }
  0x4d   :  { %1960 = vmatmul.msk.bf16.gmra.mxu1 %vm260_vm0, %v1876_v62  ;;  %1662 = vmatpush.bf16.msra.mxu0 %v2588_v38 }
  0x4e   :  { %485 = vmatmul.bf16.gmra.mxu2 %v1856_v53  ;;  %v2039_v53 = vld [vmem:[#allocation2 + $0x30] sm:$0xf] }
  0x4f   :  { %2024 = vmatmul.msk.bf16.gmra.mxu3 %vm260_vm0, %v1868_v54  ;;  %v2498_v54 = vld [vmem:[#allocation2 + $0x34] sm:$0xf0] }
  0x51   :  { %1663 = vmatpush.bf16.msra.mxu0 %v2587_v52 }
  0x5c   :  { %308 = vmatmul.bf16.gmra.mxu0 %v1872_v7 }
  0x5d   :  { %1961 = vmatmul.msk.bf16.gmra.mxu1 %vm260_vm0, %v1884_v8 }
  0x5e   :  { %490 = vmatmul.bf16.gmra.mxu2 %v1864_v61 }
  0x5f   :  { %2025 = vmatmul.msk.bf16.gmra.mxu3 %vm260_vm0, %v1876_v62  ;;  %v2040_v62 = vor.u32 %v2498_v54, %v2039_v53 }
  0x6c   :  { %313 = vmatmul.bf16.gmra.mxu0 %v1880_v15 }
  0x6d   :  { %1962 = vmatmul.msk.bf16.gmra.mxu1 %vm260_vm0, %v1892_v16 }
  0x6e   :  { %495 = vmatmul.bf16.gmra.mxu2 %v1872_v7 }
  0x6f   :  { %2026 = vmatmul.msk.bf16.gmra.mxu3 %vm260_vm0, %v1884_v8 }
  0x7c   :  { %318 = vmatmul.bf16.gmra.mxu0 %v1888_v25 }
  0x7d   :  { %1963 = vmatmul.msk.bf16.gmra.mxu1 %vm260_vm0, %v1900_v26 }
  0x7e   :  { %500 = vmatmul.bf16.gmra.mxu2 %v1880_v15  ;;  %v2586_v15 = vld [vmem:[#allocation5 + $0xe8] sm:$0xff] }
  0x7f   :  { %2027 = vmatmul.msk.bf16.gmra.mxu3 %vm260_vm0, %v1892_v16  ;;  %v2047_v16 = vld [vmem:[#allocation2 + $0x40] sm:$0xf]  ;;  %1664 = vmatpush.bf16.msra.mxu0 %v2586_v15  ;;  %v2503_v15 = vld [vmem:[#allocation2 + $0x64] sm:$0xf] }
  0x83   :  { %1665 = vmatpush.bf16.msra.mxu0 %v2585_v43  ;;  %v2541_v43 = vld [vmem:[#allocation5 + $0x10] sm:$0xff] }
  0x8c   :  { %323 = vmatmul.bf16.gmra.mxu0 %v1896_v33 }
  0x8d   :  { %1964 = vmatmul.msk.bf16.gmra.mxu1 %vm260_vm0, %v1908_v34 }
  0x8e   :  { %505 = vmatmul.bf16.gmra.mxu2 %v1888_v25 }
  0x8f   :  { %2028 = vmatmul.msk.bf16.gmra.mxu3 %vm260_vm0, %v1900_v26  ;;  %v2048_v26 = vor.u32 %v2500_v17, %v2047_v16  ;;  %v2175_v16 = vld [vmem:[#allocation2 + $0xe0] sm:$0xf]  ;;  %v2532_v17 = vld [vmem:[#allocation2 + $0xe4] sm:$0xf0] }
  0x9a   :  { %v343_v47 = vpop.f32.mrf.mxu1 }
  0x9c   :  { %328 = vmatmul.bf16.gmra.mxu0 %v1904_v45  ;;  %v2502_v45 = vld [vmem:[#allocation2 + $0x54] sm:$0xf0] }
  0x9d   :  { %782 = vmatmul.bf16.vlgmr.msrb.gmra.mxu1 %v2032_v46  ;;  %v2501_v46 = vld [vmem:[#allocation2 + $0x54] sm:$0xf]  ;;  %v2056_v54 = vor.u32 %v2502_v45, %v2055_v44  ;;  %v2071_v45 = vld [vmem:[#allocation2 + $0x70] sm:$0xf] }
  0x9e   :  { %510 = vmatmul.bf16.gmra.mxu2 %v1896_v33  ;;  %v2583_v44 = vld [vmem:[#allocation5 + $0xd0] sm:$0xff] }
  0x9f   :  { %2141 = vmatmul.msk.bf16.vlgmr.msrb.gmra.mxu3 %vm260_vm0, %v2036_v48  ;;  %v2530_v48 = vld [vmem:[#allocation2 + $0xd4] sm:$0xf0] }
  0xa2   :  { %v525_v49 = vpop.f32.mrf.mxu3  ;;  %v345_v50 = vpop.f32.mrf.mxu1 }
  0xa9   :  { %v294_v0 = vpop.f32.mrf.mxu0 }
  0xaa   :  { %v527_v61 = vpop.f32.mrf.mxu3  ;;  %v348_v1 = vpop.f32.mrf.mxu1  ;;  %v344_v4 = vadd.f32 %v343_v47, %v294_v0  ;;  %v2167_v47 = vld [vmem:[#allocation2 + $0xd0] sm:$0xf]  ;;  %v2548_v0 = vld [vmem:[#allocation5 + $0x48] sm:$0xff] }
  0xab   :  { %v2754_v55 = vor.u32 %v2530_v48, %v2167_v47  ;;  %1411 = vmatpush.bf16.msra.mxu3 %v2548_v0  ;;  %v2505_v47 = vld [vmem:[#allocation2 + $0x74] sm:$0xf]  ;;  %v2183_v48 = vld [vmem:[#allocation2 + $0xf0] sm:$0xf] }
  0xac   :  { %1182 = vmatmul.bf16.vlgmr.msrb.gmra.mxu0 %v2732_v63 }
  0xad   :  { %787 = vmatmul.bf16.gmra.mxu1 %v2040_v62 }
  0xae   :  { %2261 = vmatmul.msk.bf16.vlgmr.msrb.gmra.mxu2 %vm260_vm0, %v2734_v3 }
  0xaf   :  { %2142 = vmatmul.msk.bf16.gmra.mxu3 %vm260_vm0, %v2044_v2 }
  0xb1   :  { %v476_v7 = vpop.f32.mrf.mxu2  ;;  %v296_v10 = vpop.f32.mrf.mxu0 }
  0xb2   :  { %v530_v8 = vpop.f32.mrf.mxu3  ;;  %v477_v9 = vadd.f32 %v476_v7, %v344_v4  ;;  %v350_v11 = vpop.f32.mrf.mxu1  ;;  %v346_v12 = vadd.f32 %v345_v50, %v296_v10  ;;  %v2529_v50 = vld [vmem:[#allocation2 + $0xd4] sm:$0xf]  ;;  %v2542_v10 = vld [vmem:[#allocation5 + $0x18] sm:$0xff] }
  0xb3   :  { %v2756_v60 = vor.u32 %v2529_v50, %v2169_v51  ;;  %1360 = vmatpush.bf16.msra.mxu1 %v2542_v10  ;;  %v2073_v50 = vld [vmem:[#allocation2 + $0x78] sm:$0xf0]  ;;  %v2533_v51 = vld [vmem:[#allocation2 + $0xf4] sm:$0xf] }
  0xb4   :  { %v2740_v13 = vadd.f32 %v525_v49, %v477_v9  ;;  %v2057_v49 = vld [vmem:[#allocation2 + $0x58] sm:$0xf0]  ;;  %v2076_v0 = vor.u32 %v2505_v47, %v2073_v50 }
  0xb5   :  { %v2060_v59 = vor.u32 %v2501_v46, %v2057_v49  ;;  %v2506_v46 = vld [vmem:[#allocation2 + $0x74] sm:$0xf0] }
  0xb6   :  { %v2534_v49 = vld [vmem:[#allocation2 + $0xf4] sm:$0xf0] }
  0xb7   :  { %1361 = vmatpush.bf16.msra.mxu1 %v2541_v43 }
  0xb9   :  { %v478_v24 = vpop.f32.mrf.mxu2  ;;  %v299_v29 = vpop.f32.mrf.mxu0 }
  0xba   :  { %v532_v25 = vpop.f32.mrf.mxu3  ;;  %v479_v28 = vadd.f32 %v478_v24, %v346_v12  ;;  %v353_v30 = vpop.f32.mrf.mxu1  ;;  %v349_v33 = vadd.f32 %v348_v1, %v299_v29  ;;  %v2590_v1 = vld [vmem:[#allocation5 + $0x108] sm:$0xff]  ;;  %v2063_v12 = vld [vmem:[#allocation2 + $0x60] sm:$0xf]  ;;  %v2766_v24 = vor.u32 %v2532_v17, %v2175_v16  ;;  %v2068_v29 = vor.u32 %v2503_v15, %v2065_v18 }
  0xbb   :  { %1717 = vmatpush.bf16.msra.mxu2 %v2590_v1  ;;  %v2064_v23 = vor.u32 %v2504_v14, %v2063_v12  ;;  %v2540_v16 = vld [vmem:[#allocation5 + $0x8] sm:$0xff]  ;;  %v2079_v18 = vld [vmem:[#allocation2 + $0x80] sm:$0xf] }
  0xbc   :  { %v2746_v34 = vadd.f32 %v527_v61, %v479_v28  ;;  %1187 = vmatmul.bf16.gmra.mxu0 %v2742_v27  ;;  %v2582_v17 = vld [vmem:[#allocation5 + $0xc8] sm:$0xff]  ;;  %1362 = vmatpush.bf16.msra.mxu1 %v2540_v16 }
  0xbd   :  { %792 = vmatmul.bf16.gmra.mxu1 %v2048_v26 }
  0xbe   :  { %2262 = vmatmul.msk.bf16.gmra.mxu2 %vm260_vm0, %v2744_v32 }
  0xbf   :  { %2143 = vmatmul.msk.bf16.gmra.mxu3 %vm260_vm0, %v2052_v31 }
  0xc1   :  { %v481_v35 = vpop.f32.mrf.mxu2  ;;  %v301_v38 = vpop.f32.mrf.mxu0 }
  0xc2   :  { %v535_v36 = vpop.f32.mrf.mxu3  ;;  %v482_v37 = vadd.f32 %v481_v35, %v349_v33  ;;  %v355_v39 = vpop.f32.mrf.mxu1  ;;  %v351_v40 = vadd.f32 %v350_v11, %v301_v38  ;;  %v2584_v11 = vld [vmem:[#allocation5 + $0xd8] sm:$0xff] }
  0xc3   :  { %1666 = vmatpush.bf16.msra.mxu0 %v2584_v11 }
  0xc4   :  { %v2752_v41 = vadd.f32 %v530_v8, %v482_v37 }
  0xc7   :  { %1667 = vmatpush.bf16.msra.mxu0 %v2583_v44 }
  0xc9   :  { %v483_v52 = vpop.f32.mrf.mxu2  ;;  %v304_v57 = vpop.f32.mrf.mxu0 }
  0xca   :  { %v537_v53 = vpop.f32.mrf.mxu3  ;;  %v484_v56 = vadd.f32 %v483_v52, %v351_v40  ;;  %v358_v58 = vpop.f32.mrf.mxu1  ;;  %v354_v61 = vadd.f32 %v353_v30, %v304_v57  ;;  %v2768_v30 = vor.u32 %v2531_v19, %v2177_v20  ;;  %v2185_v52 = vld [vmem:[#allocation2 + $0xf8] sm:$0xf0]  ;;  %v2778_v57 = vor.u32 %v2534_v49, %v2183_v48  ;;  %v2508_v19 = vld [vmem:[#allocation2 + $0x84] sm:$0xf0]  ;;  %v2507_v20 = vld [vmem:[#allocation2 + $0x84] sm:$0xf] }
  0xcb   :  { %v2780_v1 = vor.u32 %v2533_v51, %v2185_v52  ;;  %1668 = vmatpush.bf16.msra.mxu0 %v2582_v17 }
  0xcc   :  { %v2758_v62 = vadd.f32 %v532_v25, %v484_v56  ;;  %1192 = vmatmul.bf16.gmra.mxu0 %v2754_v55  ;;  %v2072_v56 = vor.u32 %v2506_v46, %v2071_v45 }
  0xcd   :  { %797 = vmatmul.bf16.gmra.mxu1 %v2056_v54 }
  0xce   :  { %2263 = vmatmul.msk.bf16.gmra.mxu2 %vm260_vm0, %v2756_v60 }
  0xcf   :  { %2144 = vmatmul.msk.bf16.gmra.mxu3 %vm260_vm0, %v2060_v59 }
  0xd1   :  { %v486_v2 = vpop.f32.mrf.mxu2  ;;  %v306_v6 = vpop.f32.mrf.mxu0 }
  0xd2   :  { %v540_v4 = vpop.f32.mrf.mxu3  ;;  %v487_v5 = vadd.f32 %v486_v2, %v354_v61  ;;  %v360_v7 = vpop.f32.mrf.mxu1  ;;  %v356_v8 = vadd.f32 %v355_v39, %v306_v6  ;;  %v2589_v6 = vld [vmem:[#allocation5 + $0x100] sm:$0xff] }
  0xd3   :  { %1718 = vmatpush.bf16.msra.mxu2 %v2589_v6 }
  0xd4   :  { %v2764_v9 = vadd.f32 %v535_v36, %v487_v5  ;;  %v2547_v5 = vld [vmem:[#allocation5 + $0x40] sm:$0xff] }
  0xd5   :  { %1412 = vmatpush.bf16.msra.mxu3 %v2547_v5 }
  0xd9   :  { %v488_v21 = vpop.f32.mrf.mxu2  ;;  %v309_v26 = vpop.f32.mrf.mxu0 }
  0xda   :  { %v542_v22 = vpop.f32.mrf.mxu3  ;;  %v489_v25 = vadd.f32 %v488_v21, %v356_v8  ;;  %v363_v28 = vpop.f32.mrf.mxu1  ;;  %v359_v31 = vadd.f32 %v358_v58, %v309_v26  ;;  %v2191_v21 = vld [vmem:[#allocation2 + $0x100] sm:$0xf]  ;;  %v2193_v26 = vld [vmem:[#allocation2 + $0x108] sm:$0xf0] }
  0xdc   :  { %v2770_v33 = vadd.f32 %v537_v53, %v489_v25  ;;  %1197 = vmatmul.bf16.gmra.mxu0 %v2766_v24  ;;  %v2535_v25 = vld [vmem:[#allocation2 + $0x104] sm:$0xf] }
  0xdd   :  { %802 = vmatmul.bf16.gmra.mxu1 %v2064_v23  ;;  %v2081_v23 = vld [vmem:[#allocation2 + $0x88] sm:$0xf0]  ;;  %v2792_v43 = vor.u32 %v2535_v25, %v2193_v26 }
  0xde   :  { %2264 = vmatmul.msk.bf16.gmra.mxu2 %vm260_vm0, %v2768_v30 }
  0xdf   :  { %2145 = vmatmul.msk.bf16.gmra.mxu3 %vm260_vm0, %v2068_v29 }
  0xe1   :  { %v491_v35 = vpop.f32.mrf.mxu2  ;;  %v311_v38 = vpop.f32.mrf.mxu0 }
  0xe2   :  { %v545_v36 = vpop.f32.mrf.mxu3  ;;  %v492_v37 = vadd.f32 %v491_v35, %v359_v31  ;;  %v365_v39 = vpop.f32.mrf.mxu1  ;;  %v361_v40 = vadd.f32 %v360_v7, %v311_v38  ;;  %v2080_v31 = vor.u32 %v2508_v19, %v2079_v18 }
  0xe4   :  { %v2776_v42 = vadd.f32 %v540_v4, %v492_v37  ;;  %v2539_v37 = vld [vmem:[#allocation5] sm:$0xff] }
  0xe5   :  { %1363 = vmatpush.bf16.msra.mxu1 %v2539_v37  ;;  %v2552_v37 = vld [vmem:[#allocation2 + $0x124] sm:$0xf0] }
  0xe9   :  { %v493_v53 = vpop.f32.mrf.mxu2  ;;  %v314_v59 = vpop.f32.mrf.mxu0 }
  0xea   :  { %v547_v54 = vpop.f32.mrf.mxu3  ;;  %v494_v58 = vadd.f32 %v493_v53, %v361_v40  ;;  %v368_v61 = vpop.f32.mrf.mxu1  ;;  %v364_v2 = vadd.f32 %v363_v28, %v314_v59  ;;  %v2084_v40 = vor.u32 %v2507_v20, %v2081_v23  ;;  %v2087_v53 = vld [vmem:[#allocation2 + $0x90] sm:$0xf]  ;;  %v2538_v59 = vld [vmem:[#allocation2 + $0x114] sm:$0xf0] }
  0xec   :  { %v2782_v4 = vadd.f32 %v542_v22, %v494_v58  ;;  %1202 = vmatmul.bf16.gmra.mxu0 %v2778_v57  ;;  %v2536_v22 = vld [vmem:[#allocation2 + $0x104] sm:$0xf0]  ;;  %v2199_v58 = vld [vmem:[#allocation2 + $0x110] sm:$0xf] }
  0xed   :  { %807 = vmatmul.bf16.gmra.mxu1 %v2072_v56  ;;  %v2790_v35 = vor.u32 %v2536_v22, %v2191_v21  ;;  %v2510_v56 = vld [vmem:[#allocation2 + $0x94] sm:$0xf0] }
  0xee   :  { %2265 = vmatmul.msk.bf16.gmra.mxu2 %vm260_vm0, %v2780_v1 }
  0xef   :  { %2146 = vmatmul.msk.bf16.gmra.mxu3 %vm260_vm0, %v2076_v0  ;;  %v2537_v0 = vld [vmem:[#allocation2 + $0x114] sm:$0xf] }
  0xf1   :  { %v496_v7 = vpop.f32.mrf.mxu2  ;;  %v316_v11 = vpop.f32.mrf.mxu0 }
  0xf2   :  { %v550_v8 = vpop.f32.mrf.mxu3  ;;  %v497_v10 = vadd.f32 %v496_v7, %v364_v2  ;;  %v370_v12 = vpop.f32.mrf.mxu1  ;;  %v366_v14 = vadd.f32 %v365_v39, %v316_v11  ;;  %v2201_v2 = vld [vmem:[#allocation2 + $0x118] sm:$0xf0]  ;;  %v2088_v7 = vor.u32 %v2510_v56, %v2087_v53  ;;  %v2581_v11 = vld [vmem:[#allocation5 + $0xc0] sm:$0xff] }
  0xf3   :  { %1669 = vmatpush.bf16.msra.mxu0 %v2581_v11 }
  0xf4   :  { %v2788_v15 = vadd.f32 %v545_v36, %v497_v10  ;;  %v2802_v10 = vor.u32 %v2538_v59, %v2199_v58 }
  0xf9   :  { %v498_v28 = vpop.f32.mrf.mxu2  ;;  %v319_v38 = vpop.f32.mrf.mxu0 }
  0xfa   :  { %v552_v29 = vpop.f32.mrf.mxu3  ;;  %v499_v36 = vadd.f32 %v498_v28, %v366_v14  ;;  %v373_v39 = vpop.f32.mrf.mxu1  ;;  %v369_v44 = vadd.f32 %v368_v61, %v319_v38  ;;  %v2089_v61 = vld [vmem:[#allocation2 + $0x98] sm:$0xf0]  ;;  %v2524_v38 = vld [vmem:[#allocation2 + $0xa4] sm:$0xf0] }
  0xfc   :  { %v2794_v45 = vadd.f32 %v547_v54, %v499_v36  ;;  %1207 = vmatmul.bf16.gmra.mxu0 %v2790_v35  ;;  %v2509_v54 = vld [vmem:[#allocation2 + $0x94] sm:$0xf]  ;;  %v2271_v36 = vld [vmem:[#allocation2 + $0xa0] sm:$0xf] }
  0xfd   :  { %812 = vmatmul.bf16.gmra.mxu1 %v2080_v31  ;;  %v2207_v31 = vld [vmem:[#allocation2 + $0x120] sm:$0xf] }
  0xfe   :  { %2266 = vmatmul.msk.bf16.gmra.mxu2 %vm260_vm0, %v2792_v43 }
  0xff   :  { %2147 = vmatmul.msk.bf16.gmra.mxu3 %vm260_vm0, %v2084_v40  ;;  %v2523_v40 = vld [vmem:[#allocation2 + $0xa4] sm:$0xf] }
 0x101   :  { %v501_v46 = vpop.f32.mrf.mxu2  ;;  %v321_v49 = vpop.f32.mrf.mxu0 }
 0x102   :  { %v555_v47 = vpop.f32.mrf.mxu3  ;;  %v502_v48 = vadd.f32 %v501_v46, %v369_v44  ;;  %v375_v50 = vpop.f32.mrf.mxu1  ;;  %v371_v51 = vadd.f32 %v370_v12, %v321_v49  ;;  %v2092_v12 = vor.u32 %v2509_v54, %v2089_v61  ;;  %v2273_v44 = vld [vmem:[#allocation2 + $0xa8] sm:$0xf0]  ;;  %v2208_v49 = vor.u32 %v2552_v37, %v2207_v31 }
 0x103   :  { %v2276_v59 = vor.u32 %v2523_v40, %v2273_v44 }
 0x104   :  { %v2800_v52 = vadd.f32 %v550_v8, %v502_v48  ;;  %v2804_v8 = vor.u32 %v2537_v0, %v2201_v2 }
 0x109   :  { %v503_v5 = vpop.f32.mrf.mxu2  ;;  %v324_v16 = vpop.f32.mrf.mxu0 }
 0x10a   :  { %v557_v6 = vpop.f32.mrf.mxu3  ;;  %v504_v14 = vadd.f32 %v503_v5, %v371_v51  ;;  %v378_v17 = vpop.f32.mrf.mxu1  ;;  %v374_v18 = vadd.f32 %v373_v39, %v324_v16  ;;  %v2209_v39 = vld [vmem:[#allocation2 + $0x128] sm:$0xf0]  ;;  %v2272_v51 = vor.u32 %v2524_v38, %v2271_v36 }
 0x10c   :  { %v2806_v19 = vadd.f32 %v552_v29, %v504_v14  ;;  %1212 = vmatmul.bf16.gmra.mxu0 %v2802_v10  ;;  %v2551_v29 = vld [vmem:[#allocation2 + $0x124] sm:$0xf] }
 0x10d   :  { %817 = vmatmul.bf16.gmra.mxu1 %v2088_v7  ;;  %v2212_v58 = vor.u32 %v2551_v29, %v2209_v39  ;;  %v2821_v7 = vld [vmem:[%s2960_s2] ss:$0 sm:$0xff]  ;;  %s2685_s2 = smov [#allocation7]  }
 0x10e   :  { %2267 = vmatmul.msk.bf16.gmra.mxu2 %vm260_vm0, %v2804_v8  ;;  %s1829_s26 = sshll.u32 %s2685_s2, 4  ;;  %s1830_s26 = int_to_ptr.vmem [resolvable:$true] %s1829_s26 }
 0x10f   :  { %2148 = vmatmul.msk.bf16.gmra.mxu3 %vm260_vm0, %v2092_v12 }
 0x111   :  { %v506_v20 = vpop.f32.mrf.mxu2  ;;  %v326_v23 = vpop.f32.mrf.mxu0 }
 0x112   :  { %v560_v21 = vpop.f32.mrf.mxu3  ;;  %v507_v22 = vadd.f32 %v506_v20, %v374_v18  ;;  %v380_v25 = vpop.f32.mrf.mxu1  ;;  %v376_v26 = vadd.f32 %v375_v50, %v326_v23  ;;  %v2335_v18 = vld [vmem:[#allocation2 + $0xc0] sm:$0xf]  ;;  %v2566_v20 = vld [vmem:[#allocation2 + $0xc4] sm:$0xf0]  ;;  %v2337_v23 = vld [vmem:[#allocation2 + $0xc8] sm:$0xf0] }
 0x113   :  { %v2336_v29 = vor.u32 %v2566_v20, %v2335_v18 }
 0x114   :  { %v2812_v28 = vadd.f32 %v555_v47, %v507_v22  ;;  %v2565_v22 = vld [vmem:[#allocation2 + $0xc4] sm:$0xf] }
 0x119   :  { %v508_v46 = vpop.f32.mrf.mxu2  ;;  %v329_v56 = vpop.f32.mrf.mxu0 }
 0x11a   :  { %v562_v48 = vpop.f32.mrf.mxu3  ;;  %v509_v53 = vadd.f32 %v508_v46, %v376_v26  ;;  %v783_v54 = vpop.f32.mrf.mxu1  ;;  %v379_v50 = vadd.f32 %v378_v17, %v329_v56 }
 0x11c   :  { %v2814_v47 = vadd.f32 %v557_v6, %v509_v53  ;;  %1217 = vmatmul.bf16.gmra.mxu0 %v2208_v49 }
 0x11d   :  { %1364 = vmatmul.bf16.vlgmr.msra.gmra.mxu1 %v2272_v51 }
 0x11e   :  { %2268 = vmatmul.msk.bf16.gmra.mxu2 %vm260_vm0, %v2212_v58  ;;  %v2343_v58 = vld [vmem:[#allocation2 + $0xd0] sm:$0xf] }
 0x11f   :  { %2325 = vmatmul.msk.bf16.vlgmr.msra.gmra.mxu3 %vm260_vm0, %v2276_v59  ;;  %v2568_v59 = vld [vmem:[#allocation2 + $0xd4] sm:$0xf0] }
 0x121   :  { %v511_v61 = vpop.f32.mrf.mxu2  ;;  %v331_v11 = vpop.f32.mrf.mxu0 }
 0x122   :  { %v832_v0 = vpop.f32.mrf.mxu3  ;;  %v512_v2 = vadd.f32 %v511_v61, %v379_v50  ;;  %v785_v14 = vpop.f32.mrf.mxu1  ;;  %v381_v16 = vadd.f32 %v380_v25, %v331_v11  ;;  %v2340_v25 = vor.u32 %v2565_v22, %v2337_v23  ;;  %v2567_v50 = vld [vmem:[#allocation2 + $0xd4] sm:$0xf]  ;;  %v2345_v61 = vld [vmem:[#allocation2 + $0xd8] sm:$0xf0] }
 0x123   :  { %v833_v5 = vadd.f32 %v832_v0, %v783_v54 }
 0x124   :  { %v2823_v6 = vadd.f32 %v560_v21, %v512_v2 }
 0x125   :  { %v872_v17 = vadd.f32 %v833_v5, %v2740_v13  ;;  %v2344_v5 = vor.u32 %v2568_v59, %v2343_v58 }
 0x127   :  { %v891_v12 = vadd.f32 %v2821_v7, %v872_v17 }
 0x129   :  { %v907_v26 = vmax.f32 %v891_v12, 0.0  ;;  %v513_v31 = vpop.f32.mrf.mxu2  ;;  %v1183_v40 = vpop.f32.mrf.mxu0  ;;  %v2348_v12 = vor.u32 %v2567_v50, %v2345_v61 }
 0x12a   :  { %v834_v37 = vpop.f32.mrf.mxu3  ;;  %v514_v36 = vadd.f32 %v513_v31, %v381_v16  ;;  %v788_v39 = vpop.f32.mrf.mxu1 }
 0x12b   :  { %923 = vst [vmem:[#allocation7] sm:$0xff] %v907_v26  ;;  %v835_v38 = vadd.f32 %v834_v37, %v785_v14 }
 0x12c   :  { %v2827_v21 = vadd.f32 %v562_v48, %v514_v36  ;;  %1670 = vmatmul.bf16.vlgmr.msra.gmra.mxu0 %v2336_v29  ;;  %v2351_v36 = vld [vmem:[#allocation2 + $0xe0] sm:$0xf] }
 0x12d   :  { %v873_v13 = vadd.f32 %v835_v38, %v2746_v34  ;;  %1369 = vmatmul.bf16.gmra.mxu1 %v2732_v63  ;;  %v2570_v38 = vld [vmem:[#allocation2 + $0xe4] sm:$0xf0] }
 0x12e   :  { %2445 = vmatmul.msk.bf16.vlgmr.msra.gmra.mxu2 %vm260_vm0, %v2340_v25 }
 0x12f   :  { %v892_v44 = vadd.f32 %v2821_v7, %v873_v13  ;;  %2326 = vmatmul.msk.bf16.gmra.mxu3 %vm260_vm0, %v2734_v3 }
 0x131   :  { %v908_v46 = vmax.f32 %v892_v44, 0.0  ;;  %v1232_v51 = vpop.f32.mrf.mxu2  ;;  %v1185_v54 = vpop.f32.mrf.mxu0  ;;  %v2352_v44 = vor.u32 %v2570_v38, %v2351_v36 }
 0x132   :  { %v837_v49 = vpop.f32.mrf.mxu3  ;;  %v2835_v56 = vadd.f32 %v1232_v51, %v1183_v40  ;;  %v790_v48 = vpop.f32.mrf.mxu1  ;;  %v2353_v40 = vld [vmem:[#allocation2 + $0xe8] sm:$0xf0] }
 0x133   :  { %924 = vst [vmem:[#allocation7 + $0x8] sm:$0xff] %v908_v46  ;;  %v838_v53 = vadd.f32 %v837_v49, %v788_v39  ;;  %v2569_v39 = vld [vmem:[#allocation2 + $0xe4] sm:$0xf] }
 0x135   :  { %v874_v34 = vadd.f32 %v838_v53, %v2752_v41 }
 0x137   :  { %v893_v63 = vadd.f32 %v2821_v7, %v874_v34 }
 0x139   :  { %v909_v3 = vmax.f32 %v893_v63, 0.0  ;;  %v1234_v2 = vpop.f32.mrf.mxu2  ;;  %v1188_v17 = vpop.f32.mrf.mxu0 }
 0x13a   :  { %v839_v0 = vpop.f32.mrf.mxu3  ;;  %v2839_v14 = vadd.f32 %v1234_v2, %v1185_v54  ;;  %v793_v16 = vpop.f32.mrf.mxu1  ;;  %v2572_v2 = vld [vmem:[#allocation2 + $0xf4] sm:$0xf0] }
 0x13b   :  { %925 = vst [vmem:[#allocation7 + $0x10] sm:$0xff] %v909_v3  ;;  %v840_v11 = vadd.f32 %v839_v0, %v790_v48  ;;  %v2356_v48 = vor.u32 %v2569_v39, %v2353_v40  ;;  %v2359_v0 = vld [vmem:[#allocation2 + $0xf0] sm:$0xf]  ;;  %v2367_v40 = vld [vmem:[#allocation2 + $0x100] sm:$0xf] }
 0x13c   :  { %1675 = vmatmul.bf16.gmra.mxu0 %v2344_v5  ;;  %v2571_v5 = vld [vmem:[#allocation2 + $0xf4] sm:$0xf] }
 0x13d   :  { %v875_v18 = vadd.f32 %v840_v11, %v2758_v62  ;;  %1374 = vmatmul.bf16.gmra.mxu1 %v2742_v27  ;;  %v2361_v11 = vld [vmem:[#allocation2 + $0xf8] sm:$0xf0] }
 0x13e   :  { %2446 = vmatmul.msk.bf16.gmra.mxu2 %vm260_vm0, %v2348_v12  ;;  %v2360_v12 = vor.u32 %v2572_v2, %v2359_v0  ;;  %v2375_v2 = vld [vmem:[#allocation2 + $0x110] sm:$0xf] }
 0x13f   :  { %v894_v41 = vadd.f32 %v2821_v7, %v875_v18  ;;  %2327 = vmatmul.msk.bf16.gmra.mxu3 %vm260_vm0, %v2744_v32 }
 0x141   :  { %v910_v20 = vmax.f32 %v894_v41, 0.0  ;;  %v1237_v23 = vpop.f32.mrf.mxu2  ;;  %v1190_v29 = vpop.f32.mrf.mxu0 }
 0x142   :  { %v842_v22 = vpop.f32.mrf.mxu3  ;;  %v2847_v31 = vadd.f32 %v1237_v23, %v1188_v17  ;;  %v795_v37 = vpop.f32.mrf.mxu1  ;;  %v2364_v23 = vor.u32 %v2571_v5, %v2361_v11  ;;  %v2576_v5 = vld [vmem:[#allocation2 + $0x114] sm:$0xf0]  ;;  %v2575_v11 = vld [vmem:[#allocation2 + $0x114] sm:$0xf] }
 0x143   :  { %926 = vst [vmem:[#allocation7 + $0x18] sm:$0xff] %v910_v20  ;;  %v843_v26 = vadd.f32 %v842_v22, %v793_v16 }
 0x145   :  { %v876_v62 = vadd.f32 %v843_v26, %v2764_v9 }
 0x147   :  { %v895_v27 = vadd.f32 %v2821_v7, %v876_v62 }
 0x149   :  { %v911_v32 = vmax.f32 %v895_v27, 0.0  ;;  %v1239_v13 = vpop.f32.mrf.mxu2  ;;  %v1193_v53 = vpop.f32.mrf.mxu0 }
 0x14a   :  { %v844_v25 = vpop.f32.mrf.mxu3  ;;  %v2851_v49 = vadd.f32 %v1239_v13, %v1190_v29  ;;  %v798_v51 = vpop.f32.mrf.mxu1  ;;  %v2369_v13 = vld [vmem:[#allocation2 + $0x108] sm:$0xf0] }
 0x14b   :  { %927 = vst [vmem:[#allocation7 + $0x20] sm:$0xff] %v911_v32  ;;  %v845_v46 = vadd.f32 %v844_v25, %v795_v37  ;;  %v2574_v32 = vld [vmem:[#allocation2 + $0x104] sm:$0xf0]  ;;  %v2573_v25 = vld [vmem:[#allocation2 + $0x104] sm:$0xf] }
 0x14c   :  { %1680 = vmatmul.bf16.gmra.mxu0 %v2352_v44 }
 0x14d   :  { %v877_v54 = vadd.f32 %v845_v46, %v2770_v33  ;;  %1379 = vmatmul.bf16.gmra.mxu1 %v2754_v55 }
 0x14e   :  { %2447 = vmatmul.msk.bf16.gmra.mxu2 %vm260_vm0, %v2356_v48 }
 0x14f   :  { %v896_v9 = vadd.f32 %v2821_v7, %v877_v54  ;;  %2328 = vmatmul.msk.bf16.gmra.mxu3 %vm260_vm0, %v2756_v60 }
 0x151   :  { %v912_v34 = vmax.f32 %v896_v9, 0.0  ;;  %v1242_v58 = vpop.f32.mrf.mxu2  ;;  %v1195_v3 = vpop.f32.mrf.mxu0 }
 0x152   :  { %v847_v63 = vpop.f32.mrf.mxu3  ;;  %v2859_v50 = vadd.f32 %v1242_v58, %v1193_v53  ;;  %v800_v61 = vpop.f32.mrf.mxu1 }
 0x153   :  { %928 = vst [vmem:[#allocation7 + $0x28] sm:$0xff] %v912_v34  ;;  %v848_v59 = vadd.f32 %v847_v63, %v798_v51  ;;  %v2368_v51 = vor.u32 %v2574_v32, %v2367_v40  ;;  %v2372_v34 = vor.u32 %v2573_v25, %v2369_v13  ;;  %v2578_v40 = vld [vmem:[#allocation2 + $0x124] sm:$0xf0]  ;;  %v2577_v32 = vld [vmem:[#allocation2 + $0x124] sm:$0xf] }
 0x154   :  { %v2385_v25 = vld [vmem:[#allocation2 + $0x128] sm:$0xf0] }
 0x155   :  { %v878_v33 = vadd.f32 %v848_v59, %v2776_v42 }
 0x157   :  { %v897_v55 = vadd.f32 %v2821_v7, %v878_v33 }
 0x159   :  { %v913_v60 = vmax.f32 %v897_v55, 0.0  ;;  %v1244_v17 = vpop.f32.mrf.mxu2  ;;  %v1198_v22 = vpop.f32.mrf.mxu0 }
 0x15a   :  { %v849_v16 = vpop.f32.mrf.mxu3  ;;  %v2863_v41 = vadd.f32 %v1244_v17, %v1195_v3  ;;  %v803_v20 = vpop.f32.mrf.mxu1 }
 0x15b   :  { %929 = vst [vmem:[#allocation7 + $0x30] sm:$0xff] %v913_v60  ;;  %v850_v18 = vadd.f32 %v849_v16, %v800_v61  ;;  %v2377_v60 = vld [vmem:[#allocation2 + $0x118] sm:$0xf0] }
 0x15c   :  { %1685 = vmatmul.bf16.gmra.mxu0 %v2360_v12  ;;  %v2376_v12 = vor.u32 %v2576_v5, %v2375_v2  ;;  %v2393_v2 = vld [vmem:[#allocation2 + $0x138] sm:$0xf0] }
 0x15d   :  { %v879_v26 = vadd.f32 %v850_v18, %v2782_v4  ;;  %1384 = vmatmul.bf16.gmra.mxu1 %v2766_v24 }
 0x15e   :  { %2448 = vmatmul.msk.bf16.gmra.mxu2 %vm260_vm0, %v2364_v23 }
 0x15f   :  { %v898_v42 = vadd.f32 %v2821_v7, %v879_v26  ;;  %2329 = vmatmul.msk.bf16.gmra.mxu3 %vm260_vm0, %v2768_v30  ;;  %v2380_v26 = vor.u32 %v2575_v11, %v2377_v60 }
 0x161   :  { %v914_v37 = vmax.f32 %v898_v42, 0.0  ;;  %v1247_v62 = vpop.f32.mrf.mxu2  ;;  %v1200_v39 = vpop.f32.mrf.mxu0 }
 0x162   :  { %v852_v29 = vpop.f32.mrf.mxu3  ;;  %v2871_v36 = vadd.f32 %v1247_v62, %v1198_v22  ;;  %v805_v38 = vpop.f32.mrf.mxu1 }
 0x163   :  { %930 = vst [vmem:[#allocation7 + $0x38] sm:$0xff] %v914_v37  ;;  %v853_v27 = vadd.f32 %v852_v29, %v803_v20 }
 0x165   :  { %v880_v4 = vadd.f32 %v853_v27, %v2788_v15 }
 0x167   :  { %v899_v24 = vadd.f32 %v2821_v7, %v880_v4 }
 0x169   :  { %v915_v30 = vmax.f32 %v899_v24, 0.0  ;;  %v1249_v46 = vpop.f32.mrf.mxu2  ;;  %v1203_v9 = vpop.f32.mrf.mxu0  ;;  %v2383_v24 = vld [vmem:[#allocation2 + $0x120] sm:$0xf] }
 0x16a   :  { %v854_v44 = vpop.f32.mrf.mxu3  ;;  %v2875_v48 = vadd.f32 %v1249_v46, %v1200_v39  ;;  %v808_v54 = vpop.f32.mrf.mxu1 }
 0x16b   :  { %931 = vst [vmem:[#allocation7 + $0x40] sm:$0xff] %v915_v30  ;;  %v855_v53 = vadd.f32 %v854_v44, %v805_v38  ;;  %v2384_v44 = vor.u32 %v2578_v40, %v2383_v24 }
 0x16c   :  { %1690 = vmatmul.bf16.gmra.mxu0 %v2368_v51 }
 0x16d   :  { %v881_v63 = vadd.f32 %v855_v53, %v2794_v45  ;;  %1389 = vmatmul.bf16.gmra.mxu1 %v2778_v57 }
 0x16e   :  { %2449 = vmatmul.msk.bf16.gmra.mxu2 %vm260_vm0, %v2372_v34 }
 0x16f   :  { %v900_v15 = vadd.f32 %v2821_v7, %v881_v63  ;;  %2330 = vmatmul.msk.bf16.gmra.mxu3 %vm260_vm0, %v2780_v1 }
 0x171   :  { %v916_v58 = vmax.f32 %v900_v15, 0.0  ;;  %v1252_v61 = vpop.f32.mrf.mxu2  ;;  %v1205_v0 = vpop.f32.mrf.mxu0 }
 0x172   :  { %v857_v59 = vpop.f32.mrf.mxu3  ;;  %v2883_v33 = vadd.f32 %v1252_v61, %v1203_v9  ;;  %v810_v55 = vpop.f32.mrf.mxu1  ;;  %v2388_v9 = vor.u32 %v2577_v32, %v2385_v25 }
 0x173   :  { %932 = vst [vmem:[#allocation7 + $0x48] sm:$0xff] %v916_v58  ;;  %v858_v3 = vadd.f32 %v857_v59, %v808_v54 }
 0x175   :  { %v882_v45 = vadd.f32 %v858_v3, %v2800_v52 }
 0x177   :  { %v901_v57 = vadd.f32 %v2821_v7, %v882_v45  ;;  %v2580_v45 = vld [vmem:[#allocation2 + $0x134] sm:$0xf0] }
 0x179   :  { %v917_v1 = vmax.f32 %v901_v57, 0.0  ;;  %v1254_v17 = vpop.f32.mrf.mxu2  ;;  %v1208_v23 = vpop.f32.mrf.mxu0  ;;  %v2579_v57 = vld [vmem:[#allocation2 + $0x134] sm:$0xf] }
 0x17a   :  { %v859_v16 = vpop.f32.mrf.mxu3  ;;  %v2887_v20 = vadd.f32 %v1254_v17, %v1205_v0  ;;  %v813_v22 = vpop.f32.mrf.mxu1  ;;  %v2391_v0 = vld [vmem:[#allocation2 + $0x130] sm:$0xf] }
 0x17b   :  { %933 = vst [vmem:[#allocation7 + $0x50] sm:$0xff] %v917_v1  ;;  %v860_v18 = vadd.f32 %v859_v16, %v810_v55  ;;  %v2392_v60 = vor.u32 %v2580_v45, %v2391_v0 }
 0x17c   :  { %1695 = vmatmul.bf16.gmra.mxu0 %v2376_v12 }
 0x17d   :  { %v883_v42 = vadd.f32 %v860_v18, %v2806_v19  ;;  %1394 = vmatmul.bf16.gmra.mxu1 %v2790_v35  ;;  %v2396_v18 = vor.u32 %v2579_v57, %v2393_v2 }
 0x17e   :  { %2450 = vmatmul.msk.bf16.gmra.mxu2 %vm260_vm0, %v2380_v26 }
 0x17f   :  { %v902_v52 = vadd.f32 %v2821_v7, %v883_v42  ;;  %2331 = vmatmul.msk.bf16.gmra.mxu3 %vm260_vm0, %v2792_v43 }
 0x181   :  { %v918_v37 = vmax.f32 %v902_v52, 0.0  ;;  %v1257_v62 = vpop.f32.mrf.mxu2  ;;  %v1210_v4 = vpop.f32.mrf.mxu0 }
 0x182   :  { %v862_v29 = vpop.f32.mrf.mxu3  ;;  %v2895_v38 = vadd.f32 %v1257_v62, %v1208_v23  ;;  %v815_v39 = vpop.f32.mrf.mxu1 }
 0x183   :  { %934 = vst [vmem:[#allocation7 + $0x58] sm:$0xff] %v918_v37  ;;  %v863_v27 = vadd.f32 %v862_v29, %v813_v22 }
 0x185   :  { %v884_v19 = vadd.f32 %v863_v27, %v2812_v28 }
 0x187   :  { %v903_v35 = vadd.f32 %v2821_v7, %v884_v19 }
 0x189   :  { %v919_v43 = vmax.f32 %v903_v35, 0.0  ;;  %v1259_v30 = vpop.f32.mrf.mxu2  ;;  %v1213_v54 = vpop.f32.mrf.mxu0 }
 0x18a   :  { %v864_v13 = vpop.f32.mrf.mxu3  ;;  %v2899_v51 = vadd.f32 %v1259_v30, %v1210_v4  ;;  %v818_v53 = vpop.f32.mrf.mxu1 }
 0x18b   :  { %935 = vst [vmem:[#allocation7 + $0x60] sm:$0xff] %v919_v43  ;;  %v865_v46 = vadd.f32 %v864_v13, %v815_v39 }
 0x18c   :  { %1700 = vmatmul.bf16.gmra.mxu0 %v2384_v44 }
 0x18d   :  { %v885_v34 = vadd.f32 %v865_v46, %v2814_v47  ;;  %1399 = vmatmul.bf16.gmra.mxu1 %v2802_v10 }
 0x18e   :  { %2451 = vmatmul.msk.bf16.gmra.mxu2 %vm260_vm0, %v2388_v9 }
 0x18f   :  { %v904_v28 = vadd.f32 %v2821_v7, %v885_v34  ;;  %2332 = vmatmul.msk.bf16.gmra.mxu3 %vm260_vm0, %v2804_v8 }
 0x191   :  { %v920_v63 = vmax.f32 %v904_v28, 0.0  ;;  %v1262_v58 = vpop.f32.mrf.mxu2  ;;  %v1215_v55 = vpop.f32.mrf.mxu0 }
 0x192   :  { %v867_v15 = vpop.f32.mrf.mxu3  ;;  %v2907_v61 = vadd.f32 %v1262_v58, %v1213_v54  ;;  %v820_v3 = vpop.f32.mrf.mxu1 }
 0x193   :  { %936 = vst [vmem:[#allocation7 + $0x68] sm:$0xff] %v920_v63  ;;  %v868_v59 = vadd.f32 %v867_v15, %v818_v53 }
 0x195   :  { %v886_v47 = vadd.f32 %v868_v59, %v2823_v6 }
 0x197   :  { %v905_v10 = vadd.f32 %v2821_v7, %v886_v47 }
 0x199   :  { %v921_v8 = vmax.f32 %v905_v10, 0.0  ;;  %v1264_v11 = vpop.f32.mrf.mxu2  ;;  %v1218_v17 = vpop.f32.mrf.mxu0 }
 0x19a   :  { %v869_v5 = vpop.f32.mrf.mxu3  ;;  %v2911_v16 = vadd.f32 %v1264_v11, %v1215_v55  ;;  %v1365_v12 = vpop.f32.mrf.mxu1 }
 0x19b   :  { %937 = vst [vmem:[#allocation7 + $0x70] sm:$0xff] %v921_v8  ;;  %v870_v1 = vadd.f32 %v869_v5, %v820_v3 }
 0x19c   :  { %1705 = vmatmul.bf16.gmra.mxu0 %v2392_v60 }
 0x19d   :  { %v887_v22 = vadd.f32 %v870_v1, %v2827_v21  ;;  %v1366_v21 = vadd.f32 %v1365_v12, %v2835_v56 }
 0x19e   :  { %2452 = vmatmul.msk.bf16.gmra.mxu2 %vm260_vm0, %v2396_v18 }
 0x19f   :  { %v906_v6 = vadd.f32 %v2821_v7, %v887_v22 }
 0x1a1   :  { %v922_v23 = vmax.f32 %v906_v6, 0.0  ;;  %v1267_v26 = vpop.f32.mrf.mxu2  ;;  %v1220_v37 = vpop.f32.mrf.mxu0 }
 0x1a2   :  { %v1414_v42 = vpop.f32.mrf.mxu3  ;;  %v2916_v52 = vadd.f32 %v1267_v26, %v1218_v17  ;;  %v1367_v29 = vpop.f32.mrf.mxu1 }
 0x1a3   :  { %938 = vst [vmem:[#allocation7 + $0x78] sm:$0xff] %v922_v23  ;;  %v1415_v40 = vadd.f32 %v1414_v42, %v1366_v21  ;;  %v1368_v44 = vadd.f32 %v1367_v29, %v2839_v14 }
 0x1a9   :  { %v1269_v62 = vpop.f32.mrf.mxu2  ;;  %v1671_v19 = vpop.f32.mrf.mxu0 }
 0x1aa   :  { %v1416_v27 = vpop.f32.mrf.mxu3  ;;  %v2918_v39 = vadd.f32 %v1269_v62, %v1220_v37  ;;  %v1370_v4 = vpop.f32.mrf.mxu1 }
 0x1ab   :  { %v1417_v9 = vadd.f32 %v1416_v27, %v1368_v44  ;;  %v1371_v58 = vadd.f32 %v1370_v4, %v2847_v31 }
 0x1b1   :  { %v1720_v24 = vpop.f32.mrf.mxu2  ;;  %v1673_v43 = vpop.f32.mrf.mxu0 }
 0x1b2   :  { %v1419_v35 = vpop.f32.mrf.mxu3  ;;  %v1721_v32 = vadd.f32 %v1720_v24, %v1671_v19  ;;  %v1372_v25 = vpop.f32.mrf.mxu1 }
 0x1b3   :  { %v1420_v47 = vadd.f32 %v1419_v35, %v1371_v58  ;;  %v1373_v2 = vadd.f32 %v1372_v25, %v2851_v49 }
 0x1b4   :  { %v1760_v13 = vadd.f32 %v1721_v32, %v1415_v40 }
 0x1b6   :  { %v1776_v30 = vadd.f32 %v2821_v7, %v1760_v13 }
 0x1b8   :  { %v1792_v46 = vmax.f32 %v1776_v30, 0.0 }
 0x1b9   :  { %v1722_v54 = vpop.f32.mrf.mxu2  ;;  %v1676_v63 = vpop.f32.mrf.mxu0 }
 0x1ba   :  { %v1421_v53 = vpop.f32.mrf.mxu3  ;;  %1809 = vst [vmem:[#allocation7 + $0x80] sm:$0xff] %v1792_v46  ;;  %v1723_v34 = vadd.f32 %v1722_v54, %v1673_v43  ;;  %v1375_v28 = vpop.f32.mrf.mxu1 }
 0x1bb   :  { %v1422_v60 = vadd.f32 %v1421_v53, %v1373_v2  ;;  %v1376_v22 = vadd.f32 %v1375_v28, %v2859_v50 }
 0x1bc   :  { %v1761_v56 = vadd.f32 %v1723_v34, %v1417_v9 }
 0x1be   :  { %v1777_v15 = vadd.f32 %v2821_v7, %v1761_v56 }
 0x1c0   :  { %v1793_v59 = vmax.f32 %v1777_v15, 0.0 }
 0x1c1   :  { %v1725_v55 = vpop.f32.mrf.mxu2  ;;  %v1678_v0 = vpop.f32.mrf.mxu0 }
 0x1c2   :  { %v1424_v3 = vpop.f32.mrf.mxu3  ;;  %1810 = vst [vmem:[#allocation7 + $0x88] sm:$0xff] %v1793_v59  ;;  %v1726_v10 = vadd.f32 %v1725_v55, %v1676_v63  ;;  %v1377_v14 = vpop.f32.mrf.mxu1 }
 0x1c3   :  { %v1425_v42 = vadd.f32 %v1424_v3, %v1376_v22  ;;  %v1378_v4 = vadd.f32 %v1377_v14, %v2863_v41 }
 0x1c4   :  { %v1762_v45 = vadd.f32 %v1726_v10, %v1420_v47 }
 0x1c6   :  { %v1778_v57 = vadd.f32 %v2821_v7, %v1762_v45 }
 0x1c8   :  { %v1794_v8 = vmax.f32 %v1778_v57, 0.0 }
 0x1c9   :  { %v1727_v11 = vpop.f32.mrf.mxu2  ;;  %v1681_v31 = vpop.f32.mrf.mxu0 }
 0x1ca   :  { %v1426_v5 = vpop.f32.mrf.mxu3  ;;  %1811 = vst [vmem:[#allocation7 + $0x90] sm:$0xff] %v1794_v8  ;;  %v1728_v1 = vadd.f32 %v1727_v11, %v1678_v0  ;;  %v1380_v17 = vpop.f32.mrf.mxu1 }
 0x1cb   :  { %v1427_v24 = vadd.f32 %v1426_v5, %v1378_v4  ;;  %v1381_v13 = vadd.f32 %v1380_v17, %v2871_v36 }
 0x1cc   :  { %v1763_v12 = vadd.f32 %v1728_v1, %v1422_v60 }
 0x1ce   :  { %v1779_v18 = vadd.f32 %v2821_v7, %v1763_v12 }
 0x1d0   :  { %v1795_v6 = vmax.f32 %v1779_v18, 0.0 }
 0x1d1   :  { %v1730_v26 = vpop.f32.mrf.mxu2  ;;  %v1683_v49 = vpop.f32.mrf.mxu0 }
 0x1d2   :  { %v1429_v23 = vpop.f32.mrf.mxu3  ;;  %1812 = vst [vmem:[#allocation7 + $0x98] sm:$0xff] %v1795_v6  ;;  %v1731_v37 = vadd.f32 %v1730_v26, %v1681_v31  ;;  %v1382_v62 = vpop.f32.mrf.mxu1 }
 0x1d3   :  { %v1430_v53 = vadd.f32 %v1429_v23, %v1381_v13  ;;  %v1383_v28 = vadd.f32 %v1382_v62, %v2875_v48 }
 0x1d4   :  { %v1764_v29 = vadd.f32 %v1731_v37, %v1425_v42 }
 0x1d6   :  { %v1780_v27 = vadd.f32 %v2821_v7, %v1764_v29 }
 0x1d8   :  { %v1796_v19 = vmax.f32 %v1780_v27, 0.0 }
 0x1d9   :  { %v1732_v35 = vpop.f32.mrf.mxu2  ;;  %v1686_v50 = vpop.f32.mrf.mxu0 }
 0x1da   :  { %v1431_v21 = vpop.f32.mrf.mxu3  ;;  %1813 = vst [vmem:[#allocation7 + $0xa0] sm:$0xff] %v1796_v19  ;;  %v1733_v40 = vadd.f32 %v1732_v35, %v1683_v49  ;;  %v1385_v43 = vpop.f32.mrf.mxu1 }
 0x1db   :  { %v1432_v58 = vadd.f32 %v1431_v21, %v1383_v28  ;;  %v1386_v10 = vadd.f32 %v1385_v43, %v2883_v33 }
 0x1dc   :  { %v1765_v32 = vadd.f32 %v1733_v40, %v1427_v24 }
 0x1de   :  { %v1781_v25 = vadd.f32 %v2821_v7, %v1765_v32 }
 0x1e0   :  { %v1797_v30 = vmax.f32 %v1781_v25, 0.0 }
 0x1e1   :  { %v1735_v46 = vpop.f32.mrf.mxu2  ;;  %v1688_v41 = vpop.f32.mrf.mxu0 }
 0x1e2   :  { %v1434_v44 = vpop.f32.mrf.mxu3  ;;  %1814 = vst [vmem:[#allocation7 + $0xa8] sm:$0xff] %v1797_v30  ;;  %v1736_v54 = vadd.f32 %v1735_v46, %v1686_v50  ;;  %v1387_v56 = vpop.f32.mrf.mxu1 }
 0x1e3   :  { %v1435_v45 = vadd.f32 %v1434_v44, %v1386_v10  ;;  %v1388_v60 = vadd.f32 %v1387_v56, %v2887_v20 }
 0x1e4   :  { %v1766_v9 = vadd.f32 %v1736_v54, %v1430_v53 }
 0x1e6   :  { %v1782_v34 = vadd.f32 %v2821_v7, %v1766_v9 }
 0x1e8   :  { %v1798_v63 = vmax.f32 %v1782_v34, 0.0 }
 0x1e9   :  { %v1737_v15 = vpop.f32.mrf.mxu2  ;;  %v1691_v3 = vpop.f32.mrf.mxu0 }
 0x1ea   :  { %1815 = vst [vmem:[#allocation7 + $0xb0] sm:$0xff] %v1798_v63  ;;  %v1738_v59 = vadd.f32 %v1737_v15, %v1688_v41  ;;  %v1436_v36 = vpop.f32.mrf.mxu3  ;;  %v1390_v48 = vpop.f32.mrf.mxu1 }
 0x1eb   :  { %v1437_v17 = vadd.f32 %v1436_v36, %v1388_v60  ;;  %v1391_v26 = vadd.f32 %v1390_v48, %v2895_v38 }
 0x1ec   :  { %v1767_v55 = vadd.f32 %v1738_v59, %v1432_v58 }
 0x1ee   :  { %v1783_v47 = vadd.f32 %v2821_v7, %v1767_v55 }
 0x1f0   :  { %v1799_v14 = vmax.f32 %v1783_v47, 0.0 }
 0x1f1   :  { %v1740_v0 = vpop.f32.mrf.mxu2  ;;  %v1693_v2 = vpop.f32.mrf.mxu0 }
 0x1f2   :  { %1816 = vst [vmem:[#allocation7 + $0xb8] sm:$0xff] %v1799_v14  ;;  %v1741_v57 = vadd.f32 %v1740_v0, %v1691_v3  ;;  %v1439_v5 = vpop.f32.mrf.mxu3  ;;  %v1392_v22 = vpop.f32.mrf.mxu1 }
 0x1f3   :  { %v1440_v49 = vadd.f32 %v1439_v5, %v1391_v26  ;;  %v1393_v19 = vadd.f32 %v1392_v22, %v2899_v51 }
 0x1f4   :  { %v1768_v8 = vadd.f32 %v1741_v57, %v1435_v45 }
 0x1f6   :  { %v1784_v11 = vadd.f32 %v2821_v7, %v1768_v8 }
 0x1f8   :  { %v1800_v1 = vmax.f32 %v1784_v11, 0.0 }
 0x1f9   :  { %v1742_v31 = vpop.f32.mrf.mxu2  ;;  %v1696_v18 = vpop.f32.mrf.mxu0 }
 0x1fa   :  { %1817 = vst [vmem:[#allocation7 + $0xc0] sm:$0xff] %v1800_v1  ;;  %v1743_v12 = vadd.f32 %v1742_v31, %v1693_v2  ;;  %v1441_v23 = vpop.f32.mrf.mxu3  ;;  %v1395_v4 = vpop.f32.mrf.mxu1 }
 0x1fb   :  { %v1442_v40 = vadd.f32 %v1441_v23, %v1393_v19  ;;  %v1396_v43 = vadd.f32 %v1395_v4, %v2907_v61 }
 0x1fc   :  { %v1769_v33 = vadd.f32 %v1743_v12, %v1437_v17 }
 0x1fe   :  { %v1785_v6 = vadd.f32 %v2821_v7, %v1769_v33 }
 0x200   :  { %v1801_v42 = vmax.f32 %v1785_v6, 0.0 }
 0x201   :  { %v1745_v37 = vpop.f32.mrf.mxu2  ;;  %v1698_v62 = vpop.f32.mrf.mxu0 }
 0x202   :  { %1818 = vst [vmem:[#allocation7 + $0xc8] sm:$0xff] %v1801_v42  ;;  %v1746_v29 = vadd.f32 %v1745_v37, %v1696_v18  ;;  %v1444_v35 = vpop.f32.mrf.mxu3  ;;  %v1397_v30 = vpop.f32.mrf.mxu1 }
 0x203   :  { %v1445_v46 = vadd.f32 %v1444_v35, %v1396_v43  ;;  %v1398_v34 = vadd.f32 %v1397_v30, %v2911_v16 }
 0x204   :  { %v1770_v20 = vadd.f32 %v1746_v29, %v1440_v49 }
 0x206   :  { %v1786_v27 = vadd.f32 %v2821_v7, %v1770_v20 }
 0x208   :  { %v1802_v21 = vmax.f32 %v1786_v27, 0.0 }
 0x209   :  { %v1747_v24 = vpop.f32.mrf.mxu2  ;;  %v1701_v32 = vpop.f32.mrf.mxu0 }
 0x20a   :  { %1819 = vst [vmem:[#allocation7 + $0xd0] sm:$0xff] %v1802_v21  ;;  %v1748_v50 = vadd.f32 %v1747_v24, %v1698_v62  ;;  %v1446_v54 = vpop.f32.mrf.mxu3  ;;  %v1400_v58 = vpop.f32.mrf.mxu1 }
 0x20b   :  { %v1447_v56 = vadd.f32 %v1446_v54, %v1398_v34  ;;  %v1401_v55 = vadd.f32 %v1400_v58, %v2916_v52 }
 0x20c   :  { %v1771_v38 = vadd.f32 %v1748_v50, %v1442_v40 }
 0x20e   :  { %v1787_v25 = vadd.f32 %v2821_v7, %v1771_v38 }
 0x210   :  { %v1803_v13 = vmax.f32 %v1787_v25, 0.0 }
 0x211   :  { %v1750_v44 = vpop.f32.mrf.mxu2  ;;  %v1703_v41 = vpop.f32.mrf.mxu0 }
 0x212   :  { %1820 = vst [vmem:[#allocation7 + $0xd8] sm:$0xff] %v1803_v13  ;;  %v1751_v53 = vadd.f32 %v1750_v44, %v1701_v32  ;;  %v1449_v59 = vpop.f32.mrf.mxu3  ;;  %v1402_v16 = vpop.f32.mrf.mxu1 }
 0x213   :  { %v1450_v14 = vadd.f32 %v1449_v59, %v1401_v55  ;;  %v1403_v48 = vadd.f32 %v1402_v16, %v2918_v39 }
 0x214   :  { %v1772_v51 = vadd.f32 %v1751_v53, %v1445_v46 }
 0x216   :  { %v1788_v9 = vadd.f32 %v2821_v7, %v1772_v51 }
 0x218   :  { %v1804_v28 = vmax.f32 %v1788_v9, 0.0 }
 0x219   :  { %v1752_v63 = vpop.f32.mrf.mxu2  ;;  %v1706_v36 = vpop.f32.mrf.mxu0 }
 0x21a   :  { %1821 = vst [vmem:[#allocation7 + $0xe0] sm:$0xff] %v1804_v28  ;;  %v1753_v15 = vadd.f32 %v1752_v63, %v1703_v41  ;;  %v1451_v2 = vpop.f32.mrf.mxu3 }
 0x21b   :  { %v1452_v60 = vadd.f32 %v1451_v2, %v1403_v48 }
 0x21c   :  { %v1773_v61 = vadd.f32 %v1753_v15, %v1447_v56 }
 0x21e   :  { %v1789_v3 = vadd.f32 %v2821_v7, %v1773_v61 }
 0x220   :  { %v1805_v47 = vmax.f32 %v1789_v3, 0.0 }
 0x221   :  { %v1755_v10 = vpop.f32.mrf.mxu2  ;;  %v1708_v5 = vpop.f32.mrf.mxu0 }
 0x222   :  { %1822 = vst [vmem:[#allocation7 + $0xe8] sm:$0xff] %v1805_v47  ;;  %v1756_v0 = vadd.f32 %v1755_v10, %v1706_v36 }
 0x224   :  { %v1774_v45 = vadd.f32 %v1756_v0, %v1450_v14 }
 0x226   :  { %v1790_v57 = vadd.f32 %v2821_v7, %v1774_v45 }
 0x228   :  { %v1806_v8 = vmax.f32 %v1790_v57, 0.0 }
 0x229   :  { %v1757_v11 = vpop.f32.mrf.mxu2 }
 0x22a   :  { %1823 = vst [vmem:[#allocation7 + $0xf0] sm:$0xff] %v1806_v8  ;;  %v1758_v1 = vadd.f32 %v1757_v11, %v1708_v5 }
 0x22c   :  { %v1775_v31 = vadd.f32 %v1758_v1, %v1452_v60 }
 0x22e   :  { %v1791_v52 = vadd.f32 %v2821_v7, %v1775_v31 }
 0x230   :  { %v1807_v17 = vmax.f32 %v1791_v52, 0.0 }
 0x232   :  { %1824 = vst [vmem:[#allocation7 + $0xf8] sm:$0xff] %v1807_v17 }
 0x233   :  { %1837 = dma.vmem_to_hbm [thread:$0]  %s1830_s26, 4096, %s1832_s29, [#allocation4], %s2680_s20, %s2680_s20, %s2681_s21  }
 0x234   :  { %2677 = dma.done.wait [#allocation4], 4096  }
 0x235   :  { %2678 = vsyncadd [#allocation4], 4294963200 }
 0x236   :  { %1842 = vsyncpa [#allocation3], 1 }
 0x237   :  { %1843 = vsyncpa [#allocation6], 1 }
 0x238   :  { %1844 = vsyncpa [#allocation4], 1 }

</bundles_post_ra>
